<compile_context>
chip_gen: v7x
topology: tpu7x:2x2x1
jax: 0.10.0
libtpu: 0.0.40
codegen_flags: <defaults>
</compile_context>

<pallas_src>
from functools import partial

import jax
import jax.numpy as jnp
from jax.experimental import pallas as pl
from jax.experimental.pallas import tpu as pltpu


# ----------------------------------------------------------------------------
# Fused kernel: GroupNorm + SiLU + same-padded Conv1d, all batches in one step
# ----------------------------------------------------------------------------

def _audio_unembed_kernel(x_ref, gamma_ref, beta_ref, sel_ref, mask_ref,
                          edge_ref, w_ref, b_ref, o_ref, *, B, L, K, eps):
    """x_ref:    (B*L, C)   channels-last activations, batches stacked on rows
    gamma/beta:  (1, C)     GroupNorm affine
    sel_ref:     (B, B*L)   per-batch row selector, pre-scaled by 1/(L*Cg)
    mask_ref:    (C, G)     channel -> group one-hot (contiguous groups)
    edge_ref:    (K, B*L)   per-tap validity mask over the flattened lane axis
    w_ref:       (C, KP)    conv weights, taps fused on the lane axis (zero-padded)
    b_ref:       (Cout, 1)  conv bias
    o_ref:       (Cout, B*L) lane-dense output slab
    """
    BL, C = x_ref.shape
    Cout = b_ref.shape[0]
    half = K // 2
    f32 = jnp.float32
    tb = (((1,), (1,)), ((), ()))        # A @ B^T (contract dim 1 of both)

    x2 = x_ref[...]                      # (BL, C)
    sel = sel_ref[...]                   # (B, BL)
    mask = mask_ref[...]                 # (C, G)
    gamma = gamma_ref[...]               # (1, C)
    beta = beta_ref[...]                 # (1, C)

    # ---------------- GroupNorm (two-pass, biased variance) ----------------
    s1 = jnp.dot(sel, x2, preferred_element_type=f32)             # (B, C) scaled row sums
    mean_g = jnp.dot(s1, mask, preferred_element_type=f32)        # (B, G) group means
    mean_c = jax.lax.dot_general(mean_g, mask, tb,
                                 preferred_element_type=f32)      # (B, C) per-channel mean
    d = jnp.concatenate(
        [x2[b * L:(b + 1) * L, :] - mean_c[b:b + 1, :] for b in range(B)],
        axis=0)                                                    # (BL, C)
    s2 = jnp.dot(sel, d * d, preferred_element_type=f32)           # (B, C)
    var_g = jnp.dot(s2, mask, preferred_element_type=f32)          # (B, G)
    inv_c = jax.lax.dot_general(jax.lax.rsqrt(var_g + eps), mask, tb,
                                preferred_element_type=f32)        # (B, C)
    scale = inv_c * gamma                                           # (B, C)

    h = jnp.concatenate(
        [d[b * L:(b + 1) * L, :] * scale[b:b + 1, :] + beta for b in range(B)],
        axis=0)                                                     # (BL, C)
    h = h * jax.nn.sigmoid(h)                                       # SiLU (VPU/EUP)

    # ------------- Conv1d: one fused tap matmul + XLU lane rolls -----------
    p = jnp.dot(h, w_ref[...], preferred_element_type=f32)         # (BL, KP)
    pt = p.T                                                        # (KP, BL) lane-dense
    edge = edge_ref[...]                                            # (K, BL)
    rows = []
    for o in range(Cout):                                           # static (Cout=1)
        acc = pt[half * Cout + o:half * Cout + o + 1, :]            # center tap
        for k in range(K):                                          # static unroll
            if k == half:
                continue
            r = k * Cout + o
            shifted = pltpu.roll(pt[r:r + 1, :], shift=(half - k) % BL, axis=1)
            acc = acc + shifted * edge[k:k + 1, :]
        rows.append(acc)
    out = rows[0] if Cout == 1 else jnp.concatenate(rows, axis=0)   # (Cout, BL)
    o_ref[...] = out + b_ref[...]


# ----------------------------------------------------------------------------
# Wrapper
# ----------------------------------------------------------------------------

def audio_unembedding(x, gamma, beta, w, b, *, num_groups=32, eps=1e-5):
    """AudioUnembedding forward.

    x:     (B, L, C) channels-last (== torch input (B, C, L).transpose(1, 2))
    gamma: (C,) GroupNorm weight;  beta: (C,) GroupNorm bias
    w:     (K, C, Cout) conv weight (w[k, c, o] == torch.weight[o, c, k])
    b:     (Cout,) conv bias
    returns (B, Cout, L) - same layout as the PyTorch module output.
    """
    B, L, C = x.shape
    K, Cin, Cout = w.shape
    assert Cin == C
    assert K % 2 == 1, "'same' padding requires an odd kernel size"
    assert C % num_groups == 0
    G = num_groups
    Cg = C // G
    half = K // 2
    BL = B * L

    x2 = jnp.asarray(x, jnp.float32).reshape(BL, C)       # stack batches on rows (free)
    gamma2 = jnp.asarray(gamma, jnp.float32).reshape(1, C)
    beta2 = jnp.asarray(beta, jnp.float32).reshape(1, C)
    b2 = jnp.asarray(b, jnp.float32).reshape(Cout, 1)

    # --- host-side constants (all tiny; hoisted out of the kernel) ---
    inv_n = 1.0 / float(L * Cg)
    sel = jnp.repeat(jnp.eye(B, dtype=jnp.float32), L, axis=1) * inv_n        # (B, BL)
    c_idx = jnp.arange(C, dtype=jnp.int32)
    g_idx = jnp.arange(G, dtype=jnp.int32)
    mask_cg = (c_idx[:, None] // Cg == g_idx[None, :]).astype(jnp.float32)    # (C, G)

    # Conv taps fused on the lane axis of the weight; pad N up to a sublane
    # tile so the (BL, KP) -> (KP, BL) transpose is tile-aligned.
    KP = max(8, -(-(K * Cout) // 8) * 8)
    w_all = jnp.transpose(w, (1, 0, 2)).reshape(C, K * Cout).astype(jnp.float32)
    w_all = jnp.pad(w_all, ((0, 0), (0, KP - K * Cout)))                       # (C, KP)

    # Per-tap edge masks on the flattened (B*L) axis: zero wherever the shifted
    # read falls outside this batch element's [0, L) range (also kills the
    # cross-batch / wraparound lanes of the roll).
    l_idx = jnp.arange(L)
    edge = jnp.stack(
        [jnp.tile((l_idx + (k - half) >= 0) & (l_idx + (k - half) < L), B)
         for k in range(K)], axis=0).astype(jnp.float32)                       # (K, BL)

    out_flat = pl.pallas_call(
        partial(_audio_unembed_kernel, B=B, L=L, K=K, eps=eps),
        out_shape=jax.ShapeDtypeStruct((Cout, BL), jnp.float32),
        grid=(1,),                                   # single fused step (launch-bound problem)
        in_specs=[
            pl.BlockSpec((BL, C), lambda i: (0, 0)),
            pl.BlockSpec((1, C), lambda i: (0, 0)),
            pl.BlockSpec((1, C), lambda i: (0, 0)),
            pl.BlockSpec((B, BL), lambda i: (0, 0)),
            pl.BlockSpec((C, G), lambda i: (0, 0)),
            pl.BlockSpec((K, BL), lambda i: (0, 0)),
            pl.BlockSpec((C, KP), lambda i: (0, 0)),
            pl.BlockSpec((Cout, 1), lambda i: (0, 0)),
        ],
        out_specs=pl.BlockSpec((Cout, BL), lambda i: (0, 0)),
    )(x2, gamma2, beta2, sel, mask_cg, edge, w_all, b2)

    # (Cout, B*L) -> (B, Cout, L): layout plumbing outside the kernel.
    return jnp.transpose(out_flat.reshape(Cout, B, L), (1, 0, 2))


# ----------------------------------------------------------------------------
# Pure-JAX reference (for correctness check)
# ----------------------------------------------------------------------------

def audio_unembedding_ref(x, gamma, beta, w, b, *, num_groups=32, eps=1e-5):
    B, L, C = x.shape
    K, _, Cout = w.shape
    G = num_groups
    Cg = C // G
    xg = x.reshape(B, L, G, Cg)
    mean = xg.mean(axis=(1, 3), keepdims=True)
    var = ((xg - mean) ** 2).mean(axis=(1, 3), keepdims=True)
    h = ((xg - mean) * jax.lax.rsqrt(var + eps)).reshape(B, L, C)
    h = h * gamma.reshape(1, 1, C) + beta.reshape(1, 1, C)
    h = h * jax.nn.sigmoid(h)                       # SiLU
    hp = jnp.pad(h, ((0, 0), (K // 2, K // 2), (0, 0)))
    y = jnp.zeros((B, L, Cout), jnp.float32) + b.reshape(1, 1, Cout)
    for k in range(K):
        y = y + jnp.einsum('blc,co->blo', hp[:, k:k + L], w[k], precision='highest')
    return jnp.transpose(y, (0, 2, 1))              # (B, Cout, L) - PyTorch layout


# ----------------------------------------------------------------------------
# Main
# ----------------------------------------------------------------------------

if __name__ == "__main__":
    key = jax.random.PRNGKey(0)
    kx, kw, kb, kg, kbe = jax.random.split(key, 5)

    B, L = 2, 64
    in_channels, out_channels, K = 320, 1, 3        # module defaults

    # channels-last input; the PyTorch module would see x.transpose(1, 2) -> (B, 320, L)
    x = jax.random.normal(kx, (B, L, in_channels), jnp.float32)
    gamma = 1.0 + 0.1 * jax.random.normal(kg, (in_channels,), jnp.float32)
    beta = 0.1 * jax.random.normal(kbe, (in_channels,), jnp.float32)
    # w[k, cin, cout] == torch_conv.weight[cout, cin, k]
    w = jax.random.normal(kw, (K, in_channels, out_channels),
                          jnp.float32) / jnp.sqrt(K * in_channels)
    b = 0.01 * jax.random.normal(kb, (out_channels,), jnp.float32)

    fwd = jax.jit(lambda x_: audio_unembedding(x_, gamma, beta, w, b))
    out = jax.block_until_ready(fwd(x))

    assert out.shape == (B, out_channels, L), out.shape
    assert bool(jnp.all(jnp.isfinite(out)))

    ref = audio_unembedding_ref(x, gamma, beta, w, b)
    max_err = float(jnp.max(jnp.abs(out - ref)))
    # Tightened from 1e-2 (review): all-f32 path, expected error ~1e-5.
    assert max_err < 2e-4, f"max abs error vs reference: {max_err}"

    print("KERNEL_OK")
</pallas_src>

<mosaic_0001>
module attributes {stable_mosaic.version = 11 : i64} {
  func.func @_audio_unembed_kernel(%arg0: i32, %arg1: memref<128x320xf32, #tpu.memory_space<vmem>>, %arg2: memref<1x320xf32, #tpu.memory_space<vmem>>, %arg3: memref<1x320xf32, #tpu.memory_space<vmem>>, %arg4: memref<2x128xf32, #tpu.memory_space<vmem>>, %arg5: memref<320x32xf32, #tpu.memory_space<vmem>>, %arg6: memref<3x128xf32, #tpu.memory_space<vmem>>, %arg7: memref<320x8xf32, #tpu.memory_space<vmem>>, %arg8: memref<1x1xf32, #tpu.memory_space<vmem>>, %arg9: memref<1x128xf32, #tpu.memory_space<vmem>>) attributes {dimension_semantics = [#tpu.dimension_semantics<arbitrary>], iteration_bounds = array<i64: 1>, scalar_prefetch = 0 : i64, scratch_operands = 0 : i64, tpu.core_type = #tpu.core_type<tc>, window_params = [{pipeline_mode = #tpu.pipeline_mode<synchronous>, transform_indices = @transform_0, window_bounds = array<i64: 128, 320>}, {pipeline_mode = #tpu.pipeline_mode<synchronous>, transform_indices = @transform_1, window_bounds = array<i64: 1, 320>}, {pipeline_mode = #tpu.pipeline_mode<synchronous>, transform_indices = @transform_2, window_bounds = array<i64: 1, 320>}, {pipeline_mode = #tpu.pipeline_mode<synchronous>, transform_indices = @transform_3, window_bounds = array<i64: 2, 128>}, {pipeline_mode = #tpu.pipeline_mode<synchronous>, transform_indices = @transform_4, window_bounds = array<i64: 320, 32>}, {pipeline_mode = #tpu.pipeline_mode<synchronous>, transform_indices = @transform_5, window_bounds = array<i64: 3, 128>}, {pipeline_mode = #tpu.pipeline_mode<synchronous>, transform_indices = @transform_6, window_bounds = array<i64: 320, 8>}, {pipeline_mode = #tpu.pipeline_mode<synchronous>, transform_indices = @transform_7, window_bounds = array<i64: 1, 1>}, {pipeline_mode = #tpu.pipeline_mode<synchronous>, transform_indices = @transform_8, window_bounds = array<i64: 1, 128>}]} {
    %c0 = arith.constant 0 : index
    %c0_0 = arith.constant 0 : index
    %0 = vector.load %arg1[%c0, %c0_0] : memref<128x320xf32, #tpu.memory_space<vmem>>, vector<128x320xf32>
    %c0_1 = arith.constant 0 : index
    %c0_2 = arith.constant 0 : index
    %1 = vector.load %arg4[%c0_1, %c0_2] : memref<2x128xf32, #tpu.memory_space<vmem>>, vector<2x128xf32>
    %c0_3 = arith.constant 0 : index
    %c0_4 = arith.constant 0 : index
    %2 = vector.load %arg5[%c0_3, %c0_4] : memref<320x32xf32, #tpu.memory_space<vmem>>, vector<320x32xf32>
    %c0_5 = arith.constant 0 : index
    %c0_6 = arith.constant 0 : index
    %3 = vector.load %arg2[%c0_5, %c0_6] : memref<1x320xf32, #tpu.memory_space<vmem>>, vector<1x320xf32>
    %c0_7 = arith.constant 0 : index
    %c0_8 = arith.constant 0 : index
    %4 = vector.load %arg3[%c0_7, %c0_8] : memref<1x320xf32, #tpu.memory_space<vmem>>, vector<1x320xf32>
    %cst = arith.constant dense<0.000000e+00> : vector<2x320xf32>
    %5 = tpu.matmul %1, %0, %cst {dimension_numbers = #tpu.dot_dimension_numbers<[1], [0], [0], [1], [0, 0, 1, 1], [], []>} : vector<2x128xf32>, vector<128x320xf32>, vector<2x320xf32> -> vector<2x320xf32>
    %cst_9 = arith.constant dense<0.000000e+00> : vector<2x32xf32>
    %6 = tpu.matmul %5, %2, %cst_9 {dimension_numbers = #tpu.dot_dimension_numbers<[1], [0], [0], [1], [0, 0, 1, 1], [], []>} : vector<2x320xf32>, vector<320x32xf32>, vector<2x32xf32> -> vector<2x32xf32>
    %cst_10 = arith.constant dense<0.000000e+00> : vector<2x320xf32>
    %7 = tpu.matmul %6, %2, %cst_10 {dimension_numbers = #tpu.dot_dimension_numbers<[1], [1], [0], [0], [0, 0, 1, 0], [], []>} : vector<2x32xf32>, vector<320x32xf32>, vector<2x320xf32> -> vector<2x320xf32>
    %8 = vector.extract_strided_slice %0 {offsets = [0, 0], sizes = [64, 320], strides = [1, 1]} : vector<128x320xf32> to vector<64x320xf32>
    %9 = vector.extract_strided_slice %7 {offsets = [0, 0], sizes = [1, 320], strides = [1, 1]} : vector<2x320xf32> to vector<1x320xf32>
    %10 = vector.broadcast %9 : vector<1x320xf32> to vector<64x320xf32>
    %11 = arith.subf %8, %10 : vector<64x320xf32>
    %12 = vector.extract_strided_slice %0 {offsets = [64, 0], sizes = [64, 320], strides = [1, 1]} : vector<128x320xf32> to vector<64x320xf32>
    %13 = vector.extract_strided_slice %7 {offsets = [1, 0], sizes = [1, 320], strides = [1, 1]} : vector<2x320xf32> to vector<1x320xf32>
    %14 = vector.broadcast %13 : vector<1x320xf32> to vector<64x320xf32>
    %15 = arith.subf %12, %14 : vector<64x320xf32>
    %16 = tpu.concatenate %11, %15 in 0 : vector<64x320xf32>, vector<64x320xf32> -> vector<128x320xf32>
    %17 = arith.mulf %16, %16 : vector<128x320xf32>
    %cst_11 = arith.constant dense<0.000000e+00> : vector<2x320xf32>
    %18 = tpu.matmul %1, %17, %cst_11 {dimension_numbers = #tpu.dot_dimension_numbers<[1], [0], [0], [1], [0, 0, 1, 1], [], []>} : vector<2x128xf32>, vector<128x320xf32>, vector<2x320xf32> -> vector<2x320xf32>
    %cst_12 = arith.constant dense<0.000000e+00> : vector<2x32xf32>
    %19 = tpu.matmul %18, %2, %cst_12 {dimension_numbers = #tpu.dot_dimension_numbers<[1], [0], [0], [1], [0, 0, 1, 1], [], []>} : vector<2x320xf32>, vector<320x32xf32>, vector<2x32xf32> -> vector<2x32xf32>
    %cst_13 = arith.constant 9.99999974E-6 : f32
    %20 = vector.broadcast %cst_13 : f32 to vector<2x32xf32>
    %21 = arith.addf %19, %20 : vector<2x32xf32>
    %22 = math.rsqrt %21 : vector<2x32xf32>
    %cst_14 = arith.constant dense<0.000000e+00> : vector<2x320xf32>
    %23 = tpu.matmul %22, %2, %cst_14 {dimension_numbers = #tpu.dot_dimension_numbers<[1], [1], [0], [0], [0, 0, 1, 0], [], []>} : vector<2x32xf32>, vector<320x32xf32>, vector<2x320xf32> -> vector<2x320xf32>
    %24 = vector.broadcast %3 : vector<1x320xf32> to vector<2x320xf32>
    %25 = arith.mulf %23, %24 : vector<2x320xf32>
    %26 = vector.extract_strided_slice %16 {offsets = [0, 0], sizes = [64, 320], strides = [1, 1]} : vector<128x320xf32> to vector<64x320xf32>
    %27 = vector.extract_strided_slice %25 {offsets = [0, 0], sizes = [1, 320], strides = [1, 1]} : vector<2x320xf32> to vector<1x320xf32>
    %28 = vector.broadcast %27 : vector<1x320xf32> to vector<64x320xf32>
    %29 = arith.mulf %26, %28 : vector<64x320xf32>
    %30 = vector.broadcast %4 : vector<1x320xf32> to vector<64x320xf32>
    %31 = arith.addf %29, %30 : vector<64x320xf32>
    %32 = vector.extract_strided_slice %16 {offsets = [64, 0], sizes = [64, 320], strides = [1, 1]} : vector<128x320xf32> to vector<64x320xf32>
    %33 = vector.extract_strided_slice %25 {offsets = [1, 0], sizes = [1, 320], strides = [1, 1]} : vector<2x320xf32> to vector<1x320xf32>
    %34 = vector.broadcast %33 : vector<1x320xf32> to vector<64x320xf32>
    %35 = arith.mulf %32, %34 : vector<64x320xf32>
    %36 = vector.broadcast %4 : vector<1x320xf32> to vector<64x320xf32>
    %37 = arith.addf %35, %36 : vector<64x320xf32>
    %38 = tpu.concatenate %31, %37 in 0 : vector<64x320xf32>, vector<64x320xf32> -> vector<128x320xf32>
    %39 = arith.negf %38 : vector<128x320xf32>
    %40 = math.exp %39 : vector<128x320xf32>
    %cst_15 = arith.constant 1.000000e+00 : f32
    %41 = vector.broadcast %cst_15 : f32 to vector<128x320xf32>
    %42 = arith.addf %41, %40 : vector<128x320xf32>
    %43 = arith.divf %41, %42 : vector<128x320xf32>
    %44 = arith.mulf %38, %43 : vector<128x320xf32>
    %c0_16 = arith.constant 0 : index
    %c0_17 = arith.constant 0 : index
    %45 = vector.load %arg7[%c0_16, %c0_17] : memref<320x8xf32, #tpu.memory_space<vmem>>, vector<320x8xf32>
    %cst_18 = arith.constant dense<0.000000e+00> : vector<128x8xf32>
    %46 = tpu.matmul %44, %45, %cst_18 {dimension_numbers = #tpu.dot_dimension_numbers<[1], [0], [0], [1], [0, 0, 1, 1], [], []>} : vector<128x320xf32>, vector<320x8xf32>, vector<128x8xf32> -> vector<128x8xf32>
    %47 = tpu.transpose %46, [1, 0] : vector<128x8xf32> -> vector<8x128xf32>
    %c0_19 = arith.constant 0 : index
    %c0_20 = arith.constant 0 : index
    %48 = vector.load %arg6[%c0_19, %c0_20] : memref<3x128xf32, #tpu.memory_space<vmem>>, vector<3x128xf32>
    %49 = vector.extract_strided_slice %47 {offsets = [1, 0], sizes = [1, 128], strides = [1, 1]} : vector<8x128xf32> to vector<1x128xf32>
    %50 = vector.extract_strided_slice %47 {offsets = [0, 0], sizes = [1, 128], strides = [1, 1]} : vector<8x128xf32> to vector<1x128xf32>
    %c1_i32 = arith.constant 1 : i32
    %51 = tpu.dynamic_rotate %50 by %c1_i32 dim 1 : vector<1x128xf32>, i32 -> vector<1x128xf32>
    %52 = vector.extract_strided_slice %48 {offsets = [0, 0], sizes = [1, 128], strides = [1, 1]} : vector<3x128xf32> to vector<1x128xf32>
    %53 = arith.mulf %51, %52 : vector<1x128xf32>
    %54 = arith.addf %49, %53 : vector<1x128xf32>
    %55 = vector.extract_strided_slice %47 {offsets = [2, 0], sizes = [1, 128], strides = [1, 1]} : vector<8x128xf32> to vector<1x128xf32>
    %c127_i32 = arith.constant 127 : i32
    %56 = tpu.dynamic_rotate %55 by %c127_i32 dim 1 : vector<1x128xf32>, i32 -> vector<1x128xf32>
    %57 = vector.extract_strided_slice %48 {offsets = [2, 0], sizes = [1, 128], strides = [1, 1]} : vector<3x128xf32> to vector<1x128xf32>
    %58 = arith.mulf %56, %57 : vector<1x128xf32>
    %59 = arith.addf %54, %58 : vector<1x128xf32>
    %c0_21 = arith.constant 0 : index
    %c0_22 = arith.constant 0 : index
    %60 = vector.load %arg8[%c0_21, %c0_22] : memref<1x1xf32, #tpu.memory_space<vmem>>, vector<1x1xf32>
    %61 = vector.broadcast %60 : vector<1x1xf32> to vector<1x128xf32>
    %62 = arith.addf %59, %61 : vector<1x128xf32>
    %c0_23 = arith.constant 0 : index
    %c0_24 = arith.constant 0 : index
    %63 = vector.load %arg9[%c0_23, %c0_24] : memref<1x128xf32, #tpu.memory_space<vmem>>, vector<1x128xf32>
    tpu.vector_store %arg9[%c0_23, %c0_24], %62 {strides = array<i32>} : memref<1x128xf32, #tpu.memory_space<vmem>>, vector<1x128xf32>,
    return
  }
  func.func @transform_0(%arg0: i32) -> (i32, i32) {
    %c0_i32 = arith.constant 0 : i32
    %c0_i32_0 = arith.constant 0 : i32
    %c0_i32_1 = arith.constant 0 : i32
    return %c0_i32, %c0_i32_0 : i32, i32
  }
  func.func @transform_1(%arg0: i32) -> (i32, i32) {
    %c0_i32 = arith.constant 0 : i32
    %c0_i32_0 = arith.constant 0 : i32
    %c0_i32_1 = arith.constant 0 : i32
    return %c0_i32, %c0_i32_0 : i32, i32
  }
  func.func @transform_2(%arg0: i32) -> (i32, i32) {
    %c0_i32 = arith.constant 0 : i32
    %c0_i32_0 = arith.constant 0 : i32
    %c0_i32_1 = arith.constant 0 : i32
    return %c0_i32, %c0_i32_0 : i32, i32
  }
  func.func @transform_3(%arg0: i32) -> (i32, i32) {
    %c0_i32 = arith.constant 0 : i32
    %c0_i32_0 = arith.constant 0 : i32
    %c0_i32_1 = arith.constant 0 : i32
    return %c0_i32, %c0_i32_0 : i32, i32
  }
  func.func @transform_4(%arg0: i32) -> (i32, i32) {
    %c0_i32 = arith.constant 0 : i32
    %c0_i32_0 = arith.constant 0 : i32
    %c0_i32_1 = arith.constant 0 : i32
    return %c0_i32, %c0_i32_0 : i32, i32
  }
  func.func @transform_5(%arg0: i32) -> (i32, i32) {
    %c0_i32 = arith.constant 0 : i32
    %c0_i32_0 = arith.constant 0 : i32
    %c0_i32_1 = arith.constant 0 : i32
    return %c0_i32, %c0_i32_0 : i32, i32
  }
  func.func @transform_6(%arg0: i32) -> (i32, i32) {
    %c0_i32 = arith.constant 0 : i32
    %c0_i32_0 = arith.constant 0 : i32
    %c0_i32_1 = arith.constant 0 : i32
    return %c0_i32, %c0_i32_0 : i32, i32
  }
  func.func @transform_7(%arg0: i32) -> (i32, i32) {
    %c0_i32 = arith.constant 0 : i32
    %c0_i32_0 = arith.constant 0 : i32
    %c0_i32_1 = arith.constant 0 : i32
    return %c0_i32, %c0_i32_0 : i32, i32
  }
  func.func @transform_8(%arg0: i32) -> (i32, i32) {
    %c0_i32 = arith.constant 0 : i32
    %c0_i32_0 = arith.constant 0 : i32
    %c0_i32_1 = arith.constant 0 : i32
    return %c0_i32, %c0_i32_0 : i32, i32
  }
}

</mosaic_0001>

<bundles_post_ra>
// kernel: tile.26
= control target key start
LH: loop header
LB: loop body
LE: loop exit
PB: predicated region body
PF: predicated region fallthrough
CT: control target
= control target key end

     0   :  { %v13_v2 = vmov 0   ;;  %s30_s0 = inlined_call_operand.vmem [shape: pred[64], index: 0, kind: input, shape index: {}]   ;;  %s31_s1 = inlined_call_operand.vmem [shape: pred[2,64], index: 1, kind: output, shape index: {}]  }
   0x1   :  { %v4_v0 = vld [vmem:[%s30_s0] ss:$0 sm:$0xff] }
   0x2   :  { %v7_v1 = vand.u32 255, %v4_v0 }
   0x4   :  { %v8_v3 = vpack.c.b16 %v13_v2, %v7_v1 }
   0x6   :  { %v9_v4 = vpack.c.b8 %v13_v2, %v8_v3 }
   0x8   :  { %11 = vst [vmem:[%s31_s1] sm:$0x1] %v9_v4 }

// kernel: tile.29
= control target key start
LH: loop header
LB: loop body
LE: loop exit
PB: predicated region body
PF: predicated region fallthrough
CT: control target
= control target key end

     0   :  { %vm19_vm0 = vcmask 523264   ;;  %vm25_vm1 = vcmask 1048064   ;;  %v39_v6 = vmov 0   ;;  %s56_s0 = inlined_call_operand.vmem [shape: pred[2,64], index: 0, kind: input, shape index: {}]   ;;  %s57_s1 = inlined_call_operand.vmem [shape: pred[1,128], index: 1, kind: output, shape index: {}]  }
   0x1   :  { %v12_v0 = vld [vmem:[%s56_s0] sm:$0x1]  ;;  %s38_s0 = smov 64  }
   0x2   :  { %v13_v1 = vunpack.c.0.s8 %v12_v0 }
   0x4   :  { %17 = vst [vmem:[#allocation1] sm:$0xf] %v13_v1 }
   0xb   :  { %v22_v2 = vld [vmem:[#allocation1 + $0x1] sm:$0x1]   ;;  %v18_v3 = vld [vmem:[#allocation1] sm:$0x1]  }
   0xc   :  { %23 = vrot.lane.b32.xlu0 %v22_v2, %s38_s0  ;;  %20 = vst.msk [vmem:[#allocation0] sm:$0x1] %vm19_vm0, %v18_v3  }
  0x7e   :  { %v24_v4 = vpop.permute.xlu0 %23  }
  0x7f   :  { %26 = vst.msk [vmem:[#allocation0] sm:$0x1] %vm25_vm1, %v24_v4  }
  0x86   :  { %v31_v5 = vld [vmem:[#allocation0] sm:$0xf] }
  0x87   :  { %v33_v7 = vpack.c.b16 %v39_v6, %v31_v5 }
  0x89   :  { %v34_v8 = vpack.c.b8 %v39_v6, %v33_v7 }
  0x8b   :  { %35 = vst [vmem:[%s57_s1] sm:$0x1] %v34_v8 }

// kernel: _lambda_.1
= control target key start
LH: loop header
LB: loop body
LE: loop exit
PB: predicated region body
PF: predicated region fallthrough
CT: control target
= control target key end

     0   :  { %s4895_s0 = inlined_call_operand.vmem [shape: f32[128,320], index: 0, kind: input, shape index: {}]   ;;  %s4896_s1 = inlined_call_operand.vmem [shape: f32[1,320], index: 1, kind: input, shape index: {}]   ;;  %s4897_s2 = inlined_call_operand.vmem [shape: f32[1,320], index: 2, kind: input, shape index: {}]   ;;  %s4898_s3 = inlined_call_operand.vmem [shape: f32[2,128], index: 3, kind: input, shape index: {}]   ;;  %s4899_s4 = inlined_call_operand.vmem [shape: f32[320,32], index: 4, kind: input, shape index: {}]   ;;  %s4900_s5 = inlined_call_operand.vmem [shape: f32[3,128], index: 5, kind: input, shape index: {}]   ;;  %s4901_s6 = inlined_call_operand.hbm [shape: f32[320,8], index: 6, kind: input, shape index: {}]   ;;  %s4902_s7 = inlined_call_operand.<no memory space> [shape: f32[1,1], index: 7, kind: input, shape index: {}]   ;;  %s4903_s8 = inlined_call_operand.vmem [shape: f32[1,128], index: 8, kind: output, shape index: {}]  }
   0x1   :  { %v13_v0 = vstv %s4902_s7 }
   0x2   :  { %14 = vst [vmem:[#allocation2] sm:$0x1] %v13_v0 }
   0x3   :  { %15 = vsyncpa [#allocation4], 0  ;;  %s3427_s29 = smov [#allocation3]   ;;  %s3403_s11 = scalar_lea.hbm %s4901_s6, 5120 }
   0x4   :  { %s33_s30 = sshll.u32 %s3427_s29, 4  ;;  %p3404_p0 = scmp.ne.s32.totalorder %s4901_s6, %s3403_s11  ;;  %s34_s30 = int_to_ptr.vmem [resolvable:$true] %s33_s30 }
   0x5   :  { %p3407_p1 = scmp.lt.u32.totalorder %s3403_s11, %s4901_s6 }
   0x7   :  { %p3409_p2 = pnand %p3407_p1, %p3404_p0 }
   0x9   :  { %3412 = shalt.err (!%p3409_p2)
}
   0xa   :  { %s3413_s7 = scalar_lea.vmem %s34_s30, 5120  ;;  %p3418_p4 = scmp.lt.s32.totalorder %s34_s30, %s34_s30 }
   0xb   :  { %p3414_p3 = scmp.ne.s32.totalorder %s34_s30, %s3413_s7  ;;  %p3419_p5 = scmp.lt.s32.totalorder %s3413_s7, %s3413_s7 }
   0xd   :  { %p3420_p6 = por %p3419_p5, %p3418_p4 }
   0xf   :  { %p3421_p7 = pnand %p3420_p6, %p3414_p3 }
  0x11   :  { %3424 = shalt.err (!%p3421_p7)
}
  0x12   :  { %s3428_s16 = smov 128   ;;  %s3429_s17 = smov 8  }
  0x13   :  { %39 = dma.hbm_to_vmem [thread:$0]  %s4901_s6, 5120, %s34_s30, [#allocation4], %s3428_s16, %s3428_s16, %s3429_s17  }
  0x14   :  { %3425 = dma.done.wait [#allocation4], 5120  }
  0x15   :  { %3426 = vsyncadd [#allocation4], 4294962176  ;;  %v4904_v1 = vmov 0.0|0.0   ;;  %v4906_v2 = vmov 0.0   ;;  %vm3432_vm0 = vmmov 0   ;;  %v3503_v3 = vld [vmem:[%s4895_s0 + $0x8] sm:$0xff] }
  0x16   :  { %2854 = vmatprep.subr.bf16.mxu1 %v4904_v1  ;;  %200 = vmatprep.mubr.f32.mxu0 %v4906_v2  ;;  %v3508_v4 = vld [vmem:[%s4895_s0 + $0x20] sm:$0xff]  ;;  %v3520_v7 = vld [vmem:[%s4895_s0 + $0x18] sm:$0xff]  ;;  %v3530_v9 = vld [vmem:[%s4895_s0 + $0x50] sm:$0xff]  ;;  %vm421_vm1 = vcmask 261120   ;;  %vm277_vm3 = vcmask 523264  }
  0x17   :  { %2668 = vmatprep.mubr.msk.f32.mxu1 %vm3432_vm0, %v4906_v2  ;;  %v3513_v5 = vld [vmem:[%s4895_s0] sm:$0xff]  ;;  %v2822_v6 = vpack.c.bf16 %v3508_v4, %v3503_v3  ;;  %v3525_v8 = vld [vmem:[%s4895_s0 + $0x38] sm:$0xff]  ;;  %v3539_v12 = vld [vmem:[%s4895_s0 + $0x30] sm:$0xff] }
  0x18   :  { %v2824_v10 = vpack.c.bf16 %v3520_v7, %v3513_v5  ;;  %v2826_v11 = vpack.c.bf16 %v3530_v9, %v3525_v8  ;;  %v3544_v13 = vld [vmem:[%s4895_s0 + $0x48] sm:$0xff]  ;;  %v3549_v14 = vld [vmem:[%s4895_s0 + $0x10] sm:$0xff]  ;;  %v3564_v17 = vld [vmem:[%s4895_s0 + $0x80] sm:$0xff] }
  0x19   :  { %2823 = vmatprep.subr.bf16.mxu0 %v2822_v6  ;;  %v3554_v15 = vld [vmem:[%s4895_s0 + $0x28] sm:$0xff]  ;;  %v2828_v18 = vpack.c.bf16 %v3544_v13, %v3539_v12  ;;  %v3573_v20 = vld [vmem:[%s4895_s0 + $0x40] sm:$0xff]  ;;  %v3585_v23 = vld [vmem:[%s4895_s0 + $0x78] sm:$0xff] }
  0x1a   :  { %v3559_v16 = vld [vmem:[%s4895_s0 + $0x68] sm:$0xff]  ;;  %2825 = vmatpush1.bf16.msra.mxu0 %v2824_v10  ;;  %v2855_v19 = vpack.c.bf16 %v3554_v15, %v3549_v14  ;;  %v3580_v22 = vld [vmem:[%s4895_s0 + $0x60] sm:$0xff]  ;;  %v3590_v24 = vld [vmem:[%s4895_s0 + $0x58] sm:$0xff] }
  0x1b   :  { %2827 = vmatprep.subr.bf16.mxu0 %v2826_v11  ;;  %v2830_v21 = vpack.c.bf16 %v3564_v17, %v3559_v16  ;;  %v2858_v25 = vpack.c.bf16 %v3590_v24, %v3573_v20  ;;  %v3597_v26 = vld [vmem:[%s4895_s0 + $0x98] sm:$0xff]  ;;  %v3602_v27 = vld [vmem:[%s4895_s0 + $0xb0] sm:$0xff]  ;;  %v3613_v29 = vld [vmem:[%s4895_s0 + $0x88] sm:$0xff]  ;;  %v2832_v30 = vpack.c.bf16 %v3585_v23, %v3580_v22 }
  0x1c   :  { %2856 = vmatpush3.bf16.msra.mxu1 %v2855_v19  ;;  %v3608_v28 = vld [vmem:[%s4895_s0 + $0x70] sm:$0xff]  ;;  %v2834_v31 = vpack.c.bf16 %v3602_v27, %v3597_v26  ;;  %v3627_v33 = vld [vmem:[%s4895_s0 + $0xa8] sm:$0xff]  ;;  %v3639_v36 = vld [vmem:[%s4895_s0 + $0xe0] sm:$0xff] }
  0x1d   :  { %2857 = vmatprep.subr.bf16.mxu1 %v4904_v1  ;;  %v3622_v32 = vld [vmem:[%s4895_s0 + $0x90] sm:$0xff]  ;;  %v2861_v34 = vpack.c.bf16 %v3613_v29, %v3608_v28  ;;  %v3634_v35 = vld [vmem:[%s4895_s0 + $0xc8] sm:$0xff]  ;;  %v3645_v37 = vld [vmem:[%s4895_s0 + $0xa0] sm:$0xff] }
  0x1e   :  { %2829 = vmatpush1.bf16.msra.mxu0 %v2828_v18  ;;  %v3650_v38 = vld [vmem:[%s4895_s0 + $0xb8] sm:$0xff]  ;;  %v2836_v39 = vpack.c.bf16 %v3627_v33, %v3622_v32  ;;  %v2838_v40 = vpack.c.bf16 %v3639_v36, %v3634_v35  ;;  %v3659_v41 = vld [vmem:[%s4895_s0 + $0xc0] sm:$0xff]  ;;  %v3676_v45 = vld [vmem:[%s4895_s0 + $0x110] sm:$0xff] }
  0x1f   :  { %2831 = vmatprep.subr.bf16.mxu0 %v2830_v21  ;;  %v3664_v42 = vld [vmem:[%s4895_s0 + $0xd8] sm:$0xff]  ;;  %v2864_v43 = vpack.c.bf16 %v3650_v38, %v3645_v37  ;;  %v3682_v46 = vld [vmem:[%s4895_s0 + $0xd0] sm:$0xff]  ;;  %v3687_v47 = vld [vmem:[%s4895_s0 + $0xe8] sm:$0xff] }
  0x20   :  { %2859 = vmatpush3.bf16.msra.mxu1 %v2858_v25  ;;  %v3671_v44 = vld [vmem:[%s4895_s0 + $0xf8] sm:$0xff]  ;;  %v2840_v48 = vpack.c.bf16 %v3664_v42, %v3659_v41  ;;  %v3696_v50 = vld [vmem:[%s4895_s0 + $0xf0] sm:$0xff]  ;;  %v3701_v51 = vld [vmem:[%s4895_s0 + $0x108] sm:$0xff]  ;;  %v2867_v52 = vpack.c.bf16 %v3687_v47, %v3682_v46 }
  0x21   :  { %2860 = vmatprep.subr.bf16.mxu1 %v4904_v1  ;;  %v2842_v49 = vpack.c.bf16 %v3676_v45, %v3671_v44  ;;  %v3708_v53 = vld [vmem:[%s4895_s0 + $0x128] sm:$0xff]  ;;  %v3713_v54 = vld [vmem:[%s4895_s0 + $0x140] sm:$0xff]  ;;  %v3724_v56 = vld [vmem:[%s4895_s0 + $0x118] sm:$0xff]  ;;  %v2844_v57 = vpack.c.bf16 %v3701_v51, %v3696_v50 }
  0x22   :  { %2833 = vmatpush1.bf16.msra.mxu0 %v2832_v30  ;;  %4966 = vst [vmem:[#allocation6_spill] sm:$0xff] %v3713_v54  ;;  %v3719_v55 = vld [vmem:[%s4895_s0 + $0x100] sm:$0xff]  ;;  %v2846_v58 = vpack.c.bf16 %v3713_v54, %v3708_v53  ;;  %v3738_v60 = vld [vmem:[%s4895_s0 + $0x138] sm:$0xff]  ;;  %v3750_v63 = vld [vmem:[%s4895_s0 + $0x170] sm:$0xff] }
  0x23   :  { %2835 = vmatprep.subr.bf16.mxu0 %v2834_v31  ;;  %v3733_v59 = vld [vmem:[%s4895_s0 + $0x120] sm:$0xff]  ;;  %4968 = vst [vmem:[#allocation8_spill] sm:$0xff] %v3738_v60  ;;  %v2870_v61 = vpack.c.bf16 %v3724_v56, %v3719_v55  ;;  %v3745_v62 = vld [vmem:[%s4895_s0 + $0x158] sm:$0xff]  ;;  %4970 = vst [vmem:[#allocation10_spill] sm:$0xff] %v3750_v63 }
  0x24   :  { %2862 = vmatpush3.bf16.msra.mxu1 %v2861_v34  ;;  %4967 = vst [vmem:[#allocation7_spill] sm:$0xff] %v3733_v59  ;;  %4969 = vst [vmem:[#allocation9_spill] sm:$0xff] %v3745_v62  ;;  %v3756_v0 = vld [vmem:[%s4895_s0 + $0x130] sm:$0xff]  ;;  %v3761_v6 = vld [vmem:[%s4895_s0 + $0x148] sm:$0xff]  ;;  %v2848_v10 = vpack.c.bf16 %v3738_v60, %v3733_v59  ;;  %v2850_v11 = vpack.c.bf16 %v3750_v63, %v3745_v62 }
  0x25   :  { %2863 = vmatprep.subr.bf16.mxu1 %v4904_v1  ;;  %4971 = vst [vmem:[#allocation11_spill] sm:$0xff] %v3756_v0  ;;  %4972 = vst [vmem:[#allocation12_spill] sm:$0xff] %v3761_v6  ;;  %v3770_v18 = vld [vmem:[%s4895_s0 + $0x150] sm:$0xff]  ;;  %v3775_v19 = vld [vmem:[%s4895_s0 + $0x168] sm:$0xff]  ;;  %v2873_v21 = vpack.c.bf16 %v3761_v6, %v3756_v0 }
  0x26   :  { %2837 = vmatpush1.bf16.msra.mxu0 %v2836_v39  ;;  %4973 = vst [vmem:[#allocation13_spill] sm:$0xff] %v3770_v18  ;;  %4974 = vst [vmem:[#allocation14_spill] sm:$0xff] %v3775_v19  ;;  %v110_v25 = vld [vmem:[%s4899_s4 + $0x80] sm:$0xff]  ;;  %v111_v30 = vld [vmem:[%s4899_s4 + $0x88] sm:$0xff]  ;;  %v2852_v39 = vpack.c.bf16 %v3775_v19, %v3770_v18 }
  0x27   :  { %2839 = vmatprep.subr.bf16.mxu0 %v2838_v40  ;;  %v3789_v31 = vld [vmem:[%s4895_s0 + $0x160] sm:$0xff]  ;;  %v3794_v34 = vld [vmem:[%s4895_s0 + $0x178] sm:$0xff]  ;;  %v3798_v40 = vpack.c.bf16 %v111_v30, %v110_v25  ;;  %v96_v25 = vld [vmem:[%s4899_s4 + $0x10] sm:$0xff] }
  0x28   :  { %2865 = vmatpush3.bf16.msra.mxu1 %v2864_v43  ;;  %4975 = vst [vmem:[#allocation15_spill] sm:$0xff] %v3789_v31  ;;  %4976 = vst [vmem:[#allocation16_spill] sm:$0xff] %v3794_v34  ;;  %v94_v43 = vld [vmem:[%s4899_s4] sm:$0xff]  ;;  %v97_v30 = vld [vmem:[%s4899_s4 + $0x18] sm:$0xff] }
  0x29   :  { %2866 = vmatprep.subr.bf16.mxu1 %v4904_v1  ;;  %v116_v2 = vld [vmem:[%s4899_s4 + $0xb0] sm:$0xff]  ;;  %v131_v19 = vld [vmem:[%s4899_s4 + $0x128] sm:$0xff]  ;;  %v102_v63 = vld [vmem:[%s4899_s4 + $0x40] sm:$0xff] }
  0x2a   :  { %2841 = vmatpush1.bf16.msra.mxu0 %v2840_v48  ;;  %v95_v48 = vld [vmem:[%s4899_s4 + $0x8] sm:$0xff]  ;;  %v122_v60 = vld [vmem:[%s4899_s4 + $0xe0] sm:$0xff]  ;;  %v124_v6 = vld [vmem:[%s4899_s4 + $0xf0] sm:$0xff] }
  0x2b   :  { %2843 = vmatprep.subr.bf16.mxu0 %v2842_v49  ;;  %v2876_v49 = vpack.c.bf16 %v3794_v34, %v3789_v31  ;;  %v101_v34 = vld [vmem:[%s4899_s4 + $0x38] sm:$0xff]  ;;  %v118_v31 = vld [vmem:[%s4899_s4 + $0xc0] sm:$0xff]  ;;  %v103_v62 = vld [vmem:[%s4899_s4 + $0x48] sm:$0xff] }
  0x2c   :  { %2868 = vmatpush3.bf16.msra.mxu1 %v2867_v52  ;;  %v112_v52 = vld [vmem:[%s4899_s4 + $0x90] sm:$0xff]  ;;  %v107_v59 = vld [vmem:[%s4899_s4 + $0x68] sm:$0xff]  ;;  %v109_v0 = vld [vmem:[%s4899_s4 + $0x78] sm:$0xff] }
  0x2d   :  { %2869 = vmatprep.subr.bf16.mxu1 %v4904_v1  ;;  %vm3991_vm2 = vmpackc.low %vm421_vm1, %vm421_vm1 }
  0x2e   :  { %2845 = vmatpush1.bf16.msra.mxu0 %v2844_v57  ;;  %v113_v57 = vld [vmem:[%s4899_s4 + $0x98] sm:$0xff] }
  0x2f   :  { %2847 = vmatprep.subr.bf16.mxu0 %v2846_v58  ;;  %v126_v58 = vld [vmem:[%s4899_s4 + $0x100] sm:$0xff] }
  0x30   :  { %2871 = vmatpush3.bf16.msra.mxu1 %v2870_v61  ;;  %v127_v61 = vld [vmem:[%s4899_s4 + $0x108] sm:$0xff] }
  0x31   :  { %2872 = vmatprep.subr.bf16.mxu1 %v4904_v1 }
  0x32   :  { %2849 = vmatpush1.bf16.msra.mxu0 %v2848_v10  ;;  %v3824_v10 = vld [vmem:[%s4898_s3] sm:$0x3] }
  0x33   :  { %2851 = vmatprep.subr.bf16.mxu0 %v2850_v11  ;;  %4977 = vst [vmem:[#allocation17_spill] sm:$0xff] %v3824_v10  ;;  %v3826_v11 = vpack.c.bf16 %v95_v48, %v94_v43  ;;  %v115_v43 = vld [vmem:[%s4899_s4 + $0xa8] sm:$0xff]  ;;  %v3843_v48 = vpack.c.bf16 %v127_v61, %v126_v58  ;;  %v98_v61 = vld [vmem:[%s4899_s4 + $0x20] sm:$0xff] }
  0x34   :  { %2874 = vmatpush3.bf16.msra.mxu1 %v2873_v21  ;;  %v3829_v21 = vpack.c.bf16 %v113_v57, %v112_v52  ;;  %v128_v52 = vld [vmem:[%s4899_s4 + $0x110] sm:$0xff]  ;;  %v3854_v57 = vpack.c.bf16 %v97_v30, %v96_v25  ;;  %v117_v25 = vld [vmem:[%s4899_s4 + $0xb8] sm:$0xff] }
  0x35   :  { %2875 = vmatprep.subr.bf16.mxu1 %v4904_v1 }
  0x36   :  { %2853 = vmatpush1.bf16.msra.mxu0 %v2852_v39  ;;  %v114_v39 = vld [vmem:[%s4899_s4 + $0xa0] sm:$0xff] }
  0x37   :  { %2879 = vmatprep.subr.bf16.mxu0 %v3798_v40  ;;  %v3858_v58 = vpack.c.bf16 %v115_v43, %v114_v39  ;;  %v4978_v39 = vmov 0.0   ;;  %v4979_v43 = vmov 0.0|0.0  }
  0x38   :  { %2877 = vmatpush3.bf16.msra.mxu1 %v2876_v49  ;;  %v129_v49 = vld [vmem:[%s4899_s4 + $0x118] sm:$0xff] }
  0x39   :  { %201 = vmatmul.mubr.f32.vlgmr.msra.gmra.mrb[0].mxu0 %v3824_v10  ;;  %2910 = vmatprep.subr.bf16.mxu1 %v4904_v1  ;;  %v99_v1 = vld [vmem:[%s4899_s4 + $0x28] sm:$0xff]  ;;  %v3873_v30 = vpack.c.bf16 %v129_v49, %v128_v52  ;;  %v3888_v52 = vpack.c.bf16 %v117_v25, %v116_v2  ;;  %v100_v49 = vld [vmem:[%s4899_s4 + $0x30] sm:$0xff] }
  0x3a   :  { %2881 = vmatpush3.bf16.msra.mxu0 %v3826_v11  ;;  %v3885_v18 = vpack.c.bf16 %v99_v1, %v98_v61  ;;  %v119_v1 = vld [vmem:[%s4899_s4 + $0xc8] sm:$0xff]  ;;  %v3907_v61 = vpack.c.bf16 %v101_v34, %v100_v49  ;;  %v121_v34 = vld [vmem:[%s4899_s4 + $0xd8] sm:$0xff]  ;;  %v104_v49 = vld [vmem:[%s4899_s4 + $0x50] sm:$0xff] }
  0x3b   :  { %2669 = vmatmul.mubr.f32.vlgmr.msra.gmra.mrb[0].mxu1 %v3824_v10  ;;  %2883 = vmatprep.subr.bf16.mxu0 %v3829_v21  ;;  %v130_v10 = vld [vmem:[%s4899_s4 + $0x120] sm:$0xff]  ;;  %v3910_v25 = vpack.c.bf16 %v119_v1, %v118_v31  ;;  %v3927_v31 = vpack.c.bf16 %v103_v62, %v102_v63  ;;  %v105_v1 = vld [vmem:[%s4899_s4 + $0x58] sm:$0xff]  ;;  %v123_v62 = vld [vmem:[%s4899_s4 + $0xe8] sm:$0xff] }
  0x3c   :  { %2912 = vmatpush3.bf16.msra.mxu1 %v3843_v48  ;;  %2687 = vmatprep.mubr.msk.f32.mxu1 %vm3432_vm0, %v4978_v39  ;;  %v3903_v2 = vpack.c.bf16 %v131_v19, %v130_v10  ;;  %4980 = vst [vmem:[#allocation18_spill] sm:$0xff] %v3907_v61  ;;  %v120_v19 = vld [vmem:[%s4899_s4 + $0xd0] sm:$0xff]  ;;  %v3945_v63 = vpack.c.bf16 %v105_v1, %v104_v49  ;;  %v125_v49 = vld [vmem:[%s4899_s4 + $0xf8] sm:$0xff] }
  0x3d   :  { %2913 = vmatprep.subr.bf16.mxu1 %v4979_v43  ;;  %4981 = vst [vmem:[#allocation19_spill] sm:$0xff] %v3910_v25  ;;  %4982 = vst [vmem:[#allocation20_spill] sm:$0xff] %v3927_v31  ;;  %v3930_v10 = vpack.c.bf16 %v121_v34, %v120_v19  ;;  %v3948_v19 = vpack.c.bf16 %v123_v62, %v122_v60  ;;  %v106_v34 = vld [vmem:[%s4899_s4 + $0x60] sm:$0xff]  ;;  %v3966_v1 = vpack.c.bf16 %v125_v49, %v124_v6  ;;  %v108_v62 = vld [vmem:[%s4899_s4 + $0x70] sm:$0xff] }
  0x3e   :  { %2885 = vmatpush3.bf16.msra.mxu0 %v3854_v57  ;;  %4984 = vst [vmem:[#allocation22_spill] sm:$0xff] %v3945_v63  ;;  %v3963_v60 = vpack.c.bf16 %v107_v59, %v106_v34  ;;  %v3976_v54 = vpack.c.bf16 %v109_v0, %v108_v62  ;;  %v132_v59 = vld [vmem:[%s4899_s4 + $0x130] sm:$0xff]  ;;  %v133_v6 = vld [vmem:[%s4899_s4 + $0x138] sm:$0xff]  ;;  %v4989_v0 = vmov 0 }
  0x3f   :  { %2887 = vmatprep.subr.bf16.mxu0 %v3858_v58  ;;  %4983 = vst [vmem:[#allocation21_spill] sm:$0xff] %v3930_v10  ;;  %4985 = vst [vmem:[#allocation23_spill] sm:$0xff] %v3948_v19  ;;  %v3985_v34 = vpack.c.bf16 %v133_v6, %v132_v59  ;;  %v4990_v0 = vsel %vm3991_vm2, 4294967295, %v4989_v0 }
  0x40   :  { %2915 = vmatpush3.bf16.msra.mxu1 %v3873_v30  ;;  %4986 = vst [vmem:[#allocation24_spill] sm:$0xff] %v3963_v60  ;;  %4987 = vst [vmem:[#allocation25_spill] sm:$0xff] %v3966_v1 }
  0x41   :  { %2916 = vmatprep.subr.bf16.mxu1 %v4979_v43  ;;  %4988 = vst [vmem:[#allocation26_spill] sm:$0xff] %v3976_v54  ;;  %4991 = vst [vmem:[#allocation27_spill] sm:$0xff] %v4990_v0  ;;  %v686_v0 = vlaneseq }
  0x42   :  { %2889 = vmatpush3.bf16.msra.mxu0 %v3885_v18 }
  0x43   :  { %2891 = vmatprep.subr.bf16.mxu0 %v3888_v52 }
  0x44   :  { %2918 = vmatpush3.bf16.msra.mxu1 %v3903_v2 }
  0x45   :  { %2919 = vmatprep.subr.bf16.mxu1 %v4979_v43 }
  0x46   :  { %2893 = vmatpush3.bf16.msra.mxu0 %v3907_v61 }
  0x47   :  { %2895 = vmatprep.subr.bf16.mxu0 %v3910_v25 }
  0x48   :  { %2921 = vmatpush3.bf16.msra.mxu1 %v3985_v34 }
  0x49   :  { %2924 = vmatprep.subr.msk.bf16.mxu1 %vm3991_vm2, %v3798_v40 }
  0x4a   :  { %2897 = vmatpush3.bf16.msra.mxu0 %v3927_v31 }
  0x4b   :  { %2899 = vmatprep.subr.bf16.mxu0 %v3930_v10 }
  0x4e   :  { %2901 = vmatpush3.bf16.msra.mxu0 %v3945_v63 }
  0x4f   :  { %2903 = vmatprep.subr.bf16.mxu0 %v3948_v19 }
  0x52   :  { %2905 = vmatpush3.bf16.msra.mxu0 %v3963_v60 }
  0x53   :  { %2907 = vmatprep.subr.bf16.mxu0 %v3966_v1 }
  0x56   :  { %2909 = vmatpush3.bf16.msra.mxu0 %v3976_v54 }
  0x57   :  { %2970 = vmatprep.subr.bf16.mxu0 %v4979_v43 }
 0x10c   :  { %v202_v49 = vpop.f32.mrb[0].mxu0 }
 0x10d   :  { %v204_v62 = vpop.f32.mrb[1].mxu0 }
 0x10e   :  { %345 = vmatprep.mubr.f32.mxu0 %v204_v62  ;;  %v273_v59 = vpop.f32.mrb[0].mxu1 }
 0x10f   :  { %346 = vmatmul.mubr.f32.vlgmr.msra.gmra.mrb[2].mxu0 %v202_v49  ;;  %v2670_v6 = vpop.f32.mrb[1].mxu1  ;;  %2688 = vmatmul.mubr.msk.f32.vlgmr.msra.gmra.mrb[2].mxu1 %vm277_vm3, %v273_v59 }
 0x110   :  { %2927 = vmatpush3.bf16.xpose.msk.msra.mxu1 %vm3991_vm2, %v3826_v11  ;;  %2973 = vmatpush3.bf16.xpose.msk.msra.mxu0 %vm3991_vm2, %v3843_v48 }
 0x111   :  { %2930 = vmatprep.subr.msk.bf16.mxu1 %vm3991_vm2, %v3829_v21  ;;  %2974 = vmatprep.subr.bf16.mxu0 %v4979_v43 }
 0x112   :  { %2706 = vmatprep.mubr.msk.f32.mxu0 %vm3432_vm0, %v4978_v39 }
 0x118   :  { %2933 = vmatpush3.bf16.xpose.msk.msra.mxu1 %vm3991_vm2, %v3854_v57  ;;  %2977 = vmatpush3.bf16.xpose.msk.msra.mxu0 %vm3991_vm2, %v3873_v30 }
 0x119   :  { %2936 = vmatprep.subr.msk.bf16.mxu1 %vm3991_vm2, %v3858_v58  ;;  %2978 = vmatprep.subr.bf16.mxu0 %v4979_v43 }
 0x120   :  { %2939 = vmatpush3.bf16.xpose.msk.msra.mxu1 %vm3991_vm2, %v3885_v18  ;;  %2981 = vmatpush3.bf16.xpose.msk.msra.mxu0 %vm3991_vm2, %v3903_v2 }
 0x121   :  { %2942 = vmatprep.subr.msk.bf16.mxu1 %vm3991_vm2, %v3888_v52  ;;  %2982 = vmatprep.subr.bf16.mxu0 %v4979_v43 }
 0x128   :  { %2945 = vmatpush3.bf16.xpose.msk.msra.mxu1 %vm3991_vm2, %v3907_v61  ;;  %2985 = vmatpush3.bf16.xpose.msk.msra.mxu0 %vm3991_vm2, %v3985_v34 }
 0x129   :  { %2948 = vmatprep.subr.msk.bf16.mxu1 %vm3991_vm2, %v3910_v25 }
 0x130   :  { %2951 = vmatpush3.bf16.xpose.msk.msra.mxu1 %vm3991_vm2, %v3927_v31 }
 0x131   :  { %2954 = vmatprep.subr.msk.bf16.mxu1 %vm3991_vm2, %v3930_v10 }
 0x138   :  { %2957 = vmatpush3.bf16.xpose.msk.msra.mxu1 %vm3991_vm2, %v3945_v63 }
 0x139   :  { %2960 = vmatprep.subr.msk.bf16.mxu1 %vm3991_vm2, %v3948_v19 }
 0x140   :  { %2963 = vmatpush3.bf16.xpose.msk.msra.mxu1 %vm3991_vm2, %v3963_v60 }
 0x141   :  { %2966 = vmatprep.subr.msk.bf16.mxu1 %vm3991_vm2, %v3966_v1 }
 0x148   :  { %2969 = vmatpush3.bf16.xpose.msk.msra.mxu1 %vm3991_vm2, %v3976_v54  ;;  %v4068_v54 = vshrl.u32 %v686_v0, 7 }
 0x149   :  { %3018 = vmatprep.subr.bf16.mxu1 %v4979_v43 }
 0x14a   :  { %4992 = vst [vmem:[#allocation28_spill] sm:$0xff] %v4068_v54  ;;  %v4071_v1 = vsub.s32 0, %v4068_v54 }
 0x14c   :  { %4993 = vst [vmem:[#allocation29_spill] sm:$0xff] %v4071_v1 }
 0x1e2   :  { %v2373_v49 = vpop.f32.mrb[2].mxu0  ;;  %v417_v62 = vpop.f32.mrb[2].mxu1 }
 0x1e3   :  { %v2374_v59 = vpop.f32.mrb[3].mxu0  ;;  %v2689_v6 = vpop.f32.mrb[3].mxu1 }
 0x1e4   :  { %v2375_v63 = vadd.f32 %v2374_v59, %v2373_v49  ;;  %v4074_v49 = vsub.s32 1, %v4068_v54 }
 0x1e6   :  { %v418_v19 = vadd.f32 %v2375_v63, %v417_v62  ;;  %4994 = vst [vmem:[#allocation30_spill] sm:$0xff] %v4074_v49 }
 0x1e8   :  { %2417 = vmatprep.mubr.msk.f32.mxu1 %vm421_vm1, %v418_v19  ;;  %2707 = vmatmul.mubr.msk.f32.vlgmr.msra.gmra.mrb[4].mxu0 %vm421_vm1, %v418_v19 }
 0x1e9   :  { %2418 = vmatmul.mubr.msk.f32.vlgmr.msra.gmra.mrb[4].mxu1 %vm421_vm1, %v418_v19  ;;  %870 = vmatprep.mubr.f32.mxu0 %v4978_v39 }
 0x1ea   :  { %2741 = vmatprep.mubr.msk.f32.mxu1 %vm3432_vm0, %v4978_v39 }
 0x2bb   :  { %v682_v63 = vpop.f32.mrb[4].mxu0 }
 0x2bc   :  { %v4077_v62 = vrot.slane %v682_v63, %v4071_v1  ;;  %v611_v59 = vpop.f32.mrb[4].mxu1  ;;  %v2708_v19 = vpop.f32.mrb[5].mxu0  ;;  %v4080_v6 = vrot.slane %v682_v63, %v4074_v49 }
 0x2bd   :  { %v4083_v60 = vrot.slane %v611_v59, %v4071_v1  ;;  %v4086_v0 = vrot.slane %v611_v59, %v4074_v49  ;;  %v613_v10 = vpop.f32.mrb[5].mxu1 }
 0x2be   :  { %v693_v31 = vrot.slane %v613_v10, %v4071_v1  ;;  %v4090_v54 = vrot.slane %v613_v10, %v4074_v49  ;;  %v4094_v25 = vsub.f32 %v3549_v14, %v4077_v62  ;;  %v4098_v63 = vsub.f32 %v3554_v15, %v4077_v62 }
 0x2bf   :  { %v4102_v19 = vsub.f32 %v3513_v5, %v4083_v60  ;;  %v4106_v59 = vsub.f32 %v3520_v7, %v4083_v60  ;;  %v4110_v10 = vsub.f32 %v3573_v20, %v4077_v62  ;;  %v4114_v14 = vsub.f32 %v3590_v24, %v4077_v62 }
 0x2c0   :  { %4995 = vst [vmem:[#allocation31_spill] sm:$0xff] %v4094_v25  ;;  %4996 = vst [vmem:[#allocation32_spill] sm:$0xff] %v4098_v63  ;;  %v760_v15 = vmul.f32 %v4094_v25, %v4094_v25  ;;  %v763_v49 = vmul.f32 %v4098_v63, %v4098_v63  ;;  %v4121_v5 = vsub.f32 %v3503_v3, %v693_v31 }
 0x2c1   :  { %4997 = vst [vmem:[#allocation33_spill] sm:$0xff] %v4102_v19  ;;  %4998 = vst [vmem:[#allocation34_spill] sm:$0xff] %v4106_v59  ;;  %v4124_v7 = vsub.f32 %v3508_v4, %v693_v31  ;;  %v758_v20 = vmul.f32 %v4102_v19, %v4102_v19  ;;  %v761_v1 = vmul.f32 %v4106_v59, %v4106_v59 }
 0x2c2   :  { %v4131_v24 = vsub.f32 %v3525_v8, %v693_v31  ;;  %v4134_v25 = vsub.f32 %v3530_v9, %v693_v31  ;;  %v3019_v61 = vpack.c.bf16 %v763_v49, %v760_v15  ;;  %v759_v3 = vmul.f32 %v4121_v5, %v4121_v5 }
 0x2c3   :  { %4999 = vst [vmem:[#allocation35_spill] sm:$0xff] %v4124_v7  ;;  %v762_v4 = vmul.f32 %v4124_v7, %v4124_v7  ;;  %v766_v63 = vmul.f32 %v4110_v10, %v4110_v10  ;;  %v2988_v19 = vpack.c.bf16 %v761_v1, %v758_v20  ;;  %v769_v9 = vmul.f32 %v4114_v14, %v4114_v14 }
 0x2c4   :  { %5000 = vst [vmem:[#allocation36_spill] sm:$0xff] %v4131_v24  ;;  %5001 = vst [vmem:[#allocation37_spill] sm:$0xff] %v4134_v25  ;;  %v765_v59 = vmul.f32 %v4131_v24, %v4131_v24  ;;  %v768_v8 = vmul.f32 %v4134_v25, %v4134_v25  ;;  %3020 = vmatpush3.bf16.msra.mxu1 %v3019_v61  ;;  %v4150_v15 = vsub.f32 %v3539_v12, %v4083_v60 }
 0x2c5   :  { %v2986_v49 = vpack.c.bf16 %v762_v4, %v759_v3  ;;  %v4154_v7 = vsub.f32 %v3544_v13, %v4083_v60  ;;  %v4157_v1 = vsub.f32 %v3559_v16, %v693_v31  ;;  %3021 = vmatprep.subr.bf16.mxu1 %v4979_v43  ;;  %v3022_v25 = vpack.c.bf16 %v769_v9, %v766_v63 }
 0x2c6   :  { %v2990_v20 = vpack.c.bf16 %v768_v8, %v765_v59  ;;  %v4161_v24 = vsub.f32 %v3564_v17, %v693_v31  ;;  %v4165_v61 = vsub.f32 %v3608_v28, %v4077_v62  ;;  %v764_v12 = vmul.f32 %v4150_v15, %v4150_v15 }
 0x2c7   :  { %2987 = vmatprep.subr.bf16.mxu0 %v2986_v49  ;;  %v767_v13 = vmul.f32 %v4154_v7, %v4154_v7  ;;  %v771_v16 = vmul.f32 %v4157_v1, %v4157_v1  ;;  %v4175_v63 = vsub.f32 %v3613_v29, %v4077_v62  ;;  %v4183_v59 = vsub.f32 %v3580_v22, %v4083_v60 }
 0x2c8   :  { %2989 = vmatpush1.bf16.msra.mxu0 %v2988_v19  ;;  %v774_v17 = vmul.f32 %v4161_v24, %v4161_v24  ;;  %v772_v28 = vmul.f32 %v4165_v61, %v4165_v61  ;;  %v4187_v3 = vsub.f32 %v3585_v23, %v4083_v60  ;;  %3023 = vmatpush3.bf16.msra.mxu1 %v3022_v25 }
 0x2c9   :  { %2991 = vmatprep.subr.bf16.mxu0 %v2990_v20  ;;  %v2992_v4 = vpack.c.bf16 %v767_v13, %v764_v12  ;;  %v775_v29 = vmul.f32 %v4175_v63, %v4175_v63  ;;  %v4192_v19 = vsub.f32 %v3597_v26, %v693_v31  ;;  %3024 = vmatprep.subr.bf16.mxu1 %v4979_v43 }
 0x2ca   :  { %v2994_v8 = vpack.c.bf16 %v774_v17, %v771_v16  ;;  %v770_v22 = vmul.f32 %v4183_v59, %v4183_v59  ;;  %v773_v9 = vmul.f32 %v4187_v3, %v4187_v3  ;;  %v4200_v23 = vsub.f32 %v3602_v27, %v693_v31 }
 0x2cb   :  { %v3025_v25 = vpack.c.bf16 %v775_v29, %v772_v28  ;;  %v777_v49 = vmul.f32 %v4192_v19, %v4192_v19  ;;  %v4206_v26 = vsub.f32 %v3645_v37, %v4077_v62  ;;  %v4210_v20 = vsub.f32 %v3650_v38, %v4077_v62 }
 0x2cc   :  { %2993 = vmatpush1.bf16.msra.mxu0 %v2992_v4  ;;  %v2996_v12 = vpack.c.bf16 %v773_v9, %v770_v22  ;;  %v780_v13 = vmul.f32 %v4200_v23, %v4200_v23  ;;  %v4216_v27 = vsub.f32 %v3622_v32, %v4083_v60  ;;  %v4220_v31 = vsub.f32 %v3627_v33, %v4083_v60 }
 0x2cd   :  { %2995 = vmatprep.subr.bf16.mxu0 %v2994_v8  ;;  %3026 = vmatpush3.bf16.msra.mxu1 %v3025_v25  ;;  %v778_v37 = vmul.f32 %v4206_v26, %v4206_v26  ;;  %v781_v38 = vmul.f32 %v4210_v20, %v4210_v20  ;;  %v4228_v62 = vsub.f32 %v3634_v35, %v4090_v54 }
 0x2ce   :  { %3027 = vmatprep.subr.bf16.mxu1 %v4979_v43  ;;  %v2998_v32 = vpack.c.bf16 %v780_v13, %v777_v49  ;;  %v776_v16 = vmul.f32 %v4216_v27, %v4216_v27  ;;  %v779_v33 = vmul.f32 %v4220_v31, %v4220_v31  ;;  %v4237_v60 = vsub.f32 %v3639_v36, %v4090_v54 }
 0x2cf   :  { %v3028_v17 = vpack.c.bf16 %v781_v38, %v778_v37  ;;  %v783_v28 = vmul.f32 %v4228_v62, %v4228_v62  ;;  %v4243_v35 = vsub.f32 %v3682_v46, %v4080_v6  ;;  %v4247_v4 = vsub.f32 %v3687_v47, %v4080_v6 }
 0x2d0   :  { %2997 = vmatpush1.bf16.msra.mxu0 %v2996_v12  ;;  %v3000_v29 = vpack.c.bf16 %v779_v33, %v776_v16  ;;  %v786_v8 = vmul.f32 %v4237_v60, %v4237_v60  ;;  %v4253_v36 = vsub.f32 %v3659_v41, %v4086_v0  ;;  %v4257_v22 = vsub.f32 %v3664_v42, %v4086_v0 }
 0x2d1   :  { %2999 = vmatprep.subr.bf16.mxu0 %v2998_v32  ;;  %3029 = vmatpush3.bf16.msra.mxu1 %v3028_v17  ;;  %v784_v46 = vmul.f32 %v4243_v35, %v4243_v35  ;;  %v787_v47 = vmul.f32 %v4247_v4, %v4247_v4  ;;  %v4265_v9 = vsub.f32 %v3671_v44, %v4090_v54 }
 0x2d2   :  { %5002 = vst [vmem:[#allocation38_spill] sm:$0xff] %v4257_v22  ;;  %3030 = vmatprep.subr.bf16.mxu1 %v4979_v43  ;;  %v3002_v41 = vpack.c.bf16 %v786_v8, %v783_v28  ;;  %v782_v25 = vmul.f32 %v4253_v36, %v4253_v36  ;;  %v785_v42 = vmul.f32 %v4257_v22, %v4257_v22  ;;  %v5003_v28 = vld [vmem:[#allocation6_spill] sm:$0xff] }
 0x2d3   :  { %v4274_v49 = vsub.f32 %v3676_v45, %v4090_v54  ;;  %v3031_v12 = vpack.c.bf16 %v787_v47, %v784_v46  ;;  %v789_v13 = vmul.f32 %v4265_v9, %v4265_v9  ;;  %v4280_v44 = vsub.f32 %v3719_v55, %v4080_v6 }
 0x2d4   :  { %v4284_v37 = vsub.f32 %v3724_v56, %v4080_v6  ;;  %3001 = vmatpush1.bf16.msra.mxu0 %v3000_v29  ;;  %v3004_v38 = vpack.c.bf16 %v785_v42, %v782_v25  ;;  %v4290_v45 = vsub.f32 %v3696_v50, %v4086_v0  ;;  %v4294_v16 = vsub.f32 %v3701_v51, %v4086_v0 }
 0x2d5   :  { %v792_v32 = vmul.f32 %v4274_v49, %v4274_v49  ;;  %3003 = vmatprep.subr.bf16.mxu0 %v3002_v41  ;;  %3032 = vmatpush3.bf16.msra.mxu1 %v3031_v12  ;;  %v790_v55 = vmul.f32 %v4280_v44, %v4280_v44  ;;  %v4302_v33 = vsub.f32 %v3708_v53, %v4090_v54  ;;  %v5005_v53 = vld [vmem:[#allocation11_spill] sm:$0xff]  ;;  %v5006_v41 = vld [vmem:[#allocation12_spill] sm:$0xff] }
 0x2d6   :  { %v793_v56 = vmul.f32 %v4284_v37, %v4284_v37  ;;  %3033 = vmatprep.subr.bf16.mxu1 %v4979_v43  ;;  %v788_v17 = vmul.f32 %v4290_v45, %v4290_v45  ;;  %v791_v51 = vmul.f32 %v4294_v16, %v4294_v16  ;;  %v4311_v29 = vsub.f32 %v5003_v28, %v4090_v54 }
 0x2d7   :  { %v3006_v50 = vpack.c.bf16 %v792_v32, %v789_v13  ;;  %v795_v46 = vmul.f32 %v4302_v33, %v4302_v33  ;;  %v4317_v47 = vsub.f32 %v5005_v53, %v4080_v6  ;;  %v4321_v25 = vsub.f32 %v5006_v41, %v4080_v6  ;;  %v5007_v13 = vld [vmem:[#allocation7_spill] sm:$0xff] }
 0x2d8   :  { %5004 = vst [vmem:[#allocation6_spill] sm:$0xff] %v4311_v29  ;;  %v3034_v8 = vpack.c.bf16 %v793_v56, %v790_v55  ;;  %3005 = vmatpush1.bf16.msra.mxu0 %v3004_v38  ;;  %v3008_v42 = vpack.c.bf16 %v791_v51, %v788_v17  ;;  %v798_v12 = vmul.f32 %v4311_v29, %v4311_v29  ;;  %v5009_v55 = vld [vmem:[#allocation8_spill] sm:$0xff]  ;;  %v5011_v17 = vld [vmem:[#allocation9_spill] sm:$0xff] }
 0x2d9   :  { %v4327_v32 = vsub.f32 %v5007_v13, %v4086_v0  ;;  %v4331_v56 = vsub.f32 %v5009_v55, %v4086_v0  ;;  %3007 = vmatprep.subr.bf16.mxu0 %v3006_v50  ;;  %v796_v28 = vmul.f32 %v4317_v47, %v4317_v47  ;;  %v799_v38 = vmul.f32 %v4321_v25, %v4321_v25 }
 0x2da   :  { %3035 = vmatpush3.bf16.msra.mxu1 %v3034_v8  ;;  %v4339_v51 = vsub.f32 %v5011_v17, %v4090_v54  ;;  %v3010_v53 = vpack.c.bf16 %v798_v12, %v795_v46  ;;  %v5012_v8 = vld [vmem:[#allocation10_spill] sm:$0xff]  ;;  %v5014_v17 = vld [vmem:[#allocation15_spill] sm:$0xff]  ;;  %v5015_v46 = vld [vmem:[#allocation16_spill] sm:$0xff] }
 0x2db   :  { %5008 = vst [vmem:[#allocation11_spill] sm:$0xff] %v4327_v32  ;;  %5010 = vst [vmem:[#allocation12_spill] sm:$0xff] %v4331_v56  ;;  %3036 = vmatprep.subr.bf16.mxu1 %v4979_v43  ;;  %v794_v41 = vmul.f32 %v4327_v32, %v4327_v32  ;;  %v797_v50 = vmul.f32 %v4331_v56, %v4331_v56  ;;  %v4348_v13 = vsub.f32 %v5012_v8, %v4090_v54  ;;  %v5016_v32 = vld [vmem:[#allocation13_spill] sm:$0xff] }
 0x2dc   :  { %v3037_v55 = vpack.c.bf16 %v799_v38, %v796_v28  ;;  %v801_v22 = vmul.f32 %v4339_v51, %v4339_v51  ;;  %v4354_v29 = vsub.f32 %v5014_v17, %v4080_v6  ;;  %v4358_v12 = vsub.f32 %v5015_v46, %v4080_v6  ;;  %3009 = vmatpush1.bf16.msra.mxu0 %v3008_v42  ;;  %v5018_v28 = vld [vmem:[#allocation14_spill] sm:$0xff] }
 0x2dd   :  { %5013 = vst [vmem:[#allocation7_spill] sm:$0xff] %v4348_v13  ;;  %v804_v56 = vmul.f32 %v4348_v13, %v4348_v13  ;;  %v4364_v54 = vsub.f32 %v5016_v32, %v4086_v0  ;;  %v4368_v38 = vsub.f32 %v5018_v28, %v4086_v0  ;;  %3011 = vmatprep.subr.bf16.mxu0 %v3010_v53  ;;  %v5025_v28 = vld [vmem:[#allocation22_spill] sm:$0xff] }
 0x2de   :  { %3038 = vmatpush3.bf16.msra.mxu1 %v3037_v55  ;;  %v802_v8 = vmul.f32 %v4354_v29, %v4354_v29  ;;  %v805_v6 = vmul.f32 %v4358_v12, %v4358_v12  ;;  %v3012_v42 = vpack.c.bf16 %v797_v50, %v794_v41  ;;  %v5020_v55 = vld [vmem:[#allocation17_spill] sm:$0xff]  ;;  %v5023_v41 = vld [vmem:[#allocation20_spill] sm:$0xff] }
 0x2df   :  { %5017 = vst [vmem:[#allocation8_spill] sm:$0xff] %v4364_v54  ;;  %5019 = vst [vmem:[#allocation9_spill] sm:$0xff] %v4368_v38  ;;  %3039 = vmatprep.subr.bf16.mxu1 %v4979_v43  ;;  %v800_v17 = vmul.f32 %v4364_v54, %v4364_v54  ;;  %v803_v32 = vmul.f32 %v4368_v38, %v4368_v38  ;;  %v3014_v46 = vpack.c.bf16 %v804_v56, %v801_v22  ;;  %v5021_v22 = vld [vmem:[#allocation18_spill] sm:$0xff]  ;;  %v5022_v56 = vld [vmem:[#allocation19_spill] sm:$0xff] }
 0x2e0   :  { %v3040_v0 = vpack.c.bf16 %v805_v6, %v802_v8  ;;  %3013 = vmatpush1.bf16.msra.mxu0 %v3012_v42  ;;  %v5024_v50 = vld [vmem:[#allocation21_spill] sm:$0xff]  ;;  %v5026_v8 = vld [vmem:[#allocation23_spill] sm:$0xff]  ;;  %v5027_v6 = vld [vmem:[#allocation24_spill] sm:$0xff] }
 0x2e1   :  { %3015 = vmatprep.subr.bf16.mxu0 %v3014_v46  ;;  %v3016_v53 = vpack.c.bf16 %v803_v32, %v800_v17  ;;  %v5028_v42 = vld [vmem:[#allocation25_spill] sm:$0xff]  ;;  %v5029_v17 = vld [vmem:[#allocation26_spill] sm:$0xff] }
 0x2e2   :  { %3041 = vmatpush3.bf16.msra.mxu1 %v3040_v0  ;;  %v1730_v32 = vld [vmem:[#allocation3 + $0x20] sm:$0xff] }
 0x2e3   :  { %3074 = vmatprep.subr.bf16.mxu1 %v4979_v43 }
 0x2e4   :  { %3017 = vmatpush1.bf16.msra.mxu0 %v3016_v53 }
 0x2e5   :  { %2742 = vmatmul.mubr.f32.vlgmr.msra.gmra.mrb[6].mxu1 %v5020_v55  ;;  %3043 = vmatprep.subr.bf16.mxu0 %v3798_v40 }
 0x2e6   :  { %3076 = vmatpush3.bf16.msra.mxu1 %v3843_v48  ;;  %2760 = vmatprep.mubr.msk.f32.mxu1 %vm3432_vm0, %v4978_v39 }
 0x2e7   :  { %3077 = vmatprep.subr.bf16.mxu1 %v4979_v43  ;;  %871 = vmatmul.mubr.f32.vlgmr.msra.gmra.mrb[6].mxu0 %v5020_v55 }
 0x2e8   :  { %3045 = vmatpush3.bf16.msra.mxu0 %v3826_v11 }
 0x2e9   :  { %3047 = vmatprep.subr.bf16.mxu0 %v3829_v21 }
 0x2ea   :  { %3079 = vmatpush3.bf16.msra.mxu1 %v3873_v30 }
 0x2eb   :  { %3080 = vmatprep.subr.bf16.mxu1 %v4979_v43 }
 0x2ec   :  { %3049 = vmatpush3.bf16.msra.mxu0 %v3854_v57 }
 0x2ed   :  { %3051 = vmatprep.subr.bf16.mxu0 %v3858_v58 }
 0x2ee   :  { %3082 = vmatpush3.bf16.msra.mxu1 %v3903_v2 }
 0x2ef   :  { %3083 = vmatprep.subr.bf16.mxu1 %v4979_v43 }
 0x2f0   :  { %3053 = vmatpush3.bf16.msra.mxu0 %v3885_v18 }
 0x2f1   :  { %3055 = vmatprep.subr.bf16.mxu0 %v3888_v52 }
 0x2f2   :  { %3085 = vmatpush3.bf16.msra.mxu1 %v3985_v34 }
 0x2f3   :  { %3134 = vmatprep.subr.bf16.mxu1 %v4979_v43 }
 0x2f4   :  { %3057 = vmatpush3.bf16.msra.mxu0 %v5021_v22 }
 0x2f5   :  { %3059 = vmatprep.subr.bf16.mxu0 %v5022_v56 }
 0x2f8   :  { %3061 = vmatpush3.bf16.msra.mxu0 %v5023_v41 }
 0x2f9   :  { %3063 = vmatprep.subr.bf16.mxu0 %v5024_v50 }
 0x2fc   :  { %3065 = vmatpush3.bf16.msra.mxu0 %v5025_v28 }
 0x2fd   :  { %3067 = vmatprep.subr.bf16.mxu0 %v5026_v8 }
 0x300   :  { %3069 = vmatpush3.bf16.msra.mxu0 %v5027_v6 }
 0x301   :  { %3071 = vmatprep.subr.bf16.mxu0 %v5028_v42 }
 0x304   :  { %3073 = vmatpush3.bf16.msra.mxu0 %v5029_v17 }
 0x305   :  { %3088 = vmatprep.subr.msk.bf16.mxu0 %vm3991_vm2, %v3798_v40 }
 0x3b8   :  { %v943_v46 = vpop.f32.mrb[6].mxu1 }
 0x3b9   :  { %v2743_v0 = vpop.f32.mrb[7].mxu1  ;;  %2761 = vmatmul.mubr.msk.f32.vlgmr.msra.gmra.mrb[8].mxu1 %vm277_vm3, %v943_v46 }
 0x3ba   :  { %3137 = vmatpush3.bf16.xpose.msk.msra.mxu1 %vm3991_vm2, %v3843_v48  ;;  %2779 = vmatprep.mubr.msk.f32.mxu1 %vm3432_vm0, %v4978_v39  ;;  %v872_v53 = vpop.f32.mrb[6].mxu0  ;;  %v1742_v39 = vld [vmem:[#allocation3 + $0x80] sm:$0xff]  ;;  %v1731_v0 = vld [vmem:[#allocation3 + $0x28] sm:$0xff] }
 0x3bb   :  { %3138 = vmatprep.subr.bf16.mxu1 %v4979_v43  ;;  %v874_v55 = vpop.f32.mrb[7].mxu0 }
 0x3bc   :  { %1014 = vmatprep.mubr.f32.mxu0 %v874_v55  ;;  %v1759_v55 = vld [vmem:[#allocation3 + $0x108] sm:$0xff] }
 0x3bd   :  { %1015 = vmatmul.mubr.f32.vlgmr.msra.gmra.mrb[8].mxu0 %v872_v53  ;;  %v1758_v53 = vld [vmem:[#allocation3 + $0x100] sm:$0xff] }
 0x3be   :  { %3091 = vmatpush3.bf16.xpose.msk.msra.mxu0 %vm3991_vm2, %v3826_v11 }
 0x3bf   :  { %3094 = vmatprep.subr.msk.bf16.mxu0 %vm3991_vm2, %v3829_v21 }
 0x3c2   :  { %3141 = vmatpush3.bf16.xpose.msk.msra.mxu1 %vm3991_vm2, %v3873_v30 }
 0x3c3   :  { %3142 = vmatprep.subr.bf16.mxu1 %v4979_v43 }
 0x3c6   :  { %3097 = vmatpush3.bf16.xpose.msk.msra.mxu0 %vm3991_vm2, %v3854_v57 }
 0x3c7   :  { %3100 = vmatprep.subr.msk.bf16.mxu0 %vm3991_vm2, %v3858_v58 }
 0x3ca   :  { %3145 = vmatpush3.bf16.xpose.msk.msra.mxu1 %vm3991_vm2, %v3903_v2 }
 0x3cb   :  { %3146 = vmatprep.subr.bf16.mxu1 %v4979_v43  ;;  %v1743_v43 = vld [vmem:[#allocation3 + $0x88] sm:$0xff] }
 0x3cc   :  { %v3150_v2 = vpack.c.bf16 %v1743_v43, %v1742_v39  ;;  %v1733_v43 = vld [vmem:[#allocation3 + $0x38] sm:$0xff] }
 0x3ce   :  { %3103 = vmatpush3.bf16.xpose.msk.msra.mxu0 %vm3991_vm2, %v3885_v18 }
 0x3cf   :  { %3106 = vmatprep.subr.msk.bf16.mxu0 %vm3991_vm2, %v3888_v52  ;;  %v1726_v52 = vld [vmem:[#allocation3] sm:$0xff] }
 0x3d2   :  { %3149 = vmatpush3.bf16.xpose.msk.msra.mxu1 %vm3991_vm2, %v3985_v34  ;;  %v1727_v34 = vld [vmem:[#allocation3 + $0x8] sm:$0xff] }
 0x3d3   :  { %3151 = vmatprep.subr.bf16.mxu1 %v3150_v2  ;;  %v1763_v2 = vld [vmem:[#allocation3 + $0x128] sm:$0xff] }
 0x3d6   :  { %3109 = vmatpush3.bf16.xpose.msk.msra.mxu0 %vm3991_vm2, %v5021_v22  ;;  %v1744_v22 = vld [vmem:[#allocation3 + $0x90] sm:$0xff] }
 0x3d7   :  { %3112 = vmatprep.subr.msk.bf16.mxu0 %vm3991_vm2, %v5022_v56  ;;  %v1745_v56 = vld [vmem:[#allocation3 + $0x98] sm:$0xff] }
 0x3de   :  { %3115 = vmatpush3.bf16.xpose.msk.msra.mxu0 %vm3991_vm2, %v5023_v41  ;;  %v3152_v41 = vpack.c.bf16 %v1727_v34, %v1726_v52  ;;  %v1762_v52 = vld [vmem:[#allocation3 + $0x120] sm:$0xff] }
 0x3df   :  { %3118 = vmatprep.subr.msk.bf16.mxu0 %vm3991_vm2, %v5024_v50  ;;  %v3154_v50 = vpack.c.bf16 %v1745_v56, %v1744_v22  ;;  %v1750_v34 = vld [vmem:[#allocation3 + $0xc0] sm:$0xff]  ;;  %v1751_v22 = vld [vmem:[#allocation3 + $0xc8] sm:$0xff]  ;;  %v3190_v56 = vpack.c.bf16 %v1763_v2, %v1762_v52  ;;  %v1740_v2 = vld [vmem:[#allocation3 + $0x70] sm:$0xff] }
 0x3e6   :  { %3121 = vmatpush3.bf16.xpose.msk.msra.mxu0 %vm3991_vm2, %v5025_v28  ;;  %v1728_v28 = vld [vmem:[#allocation3 + $0x10] sm:$0xff] }
 0x3e7   :  { %3124 = vmatprep.subr.msk.bf16.mxu0 %vm3991_vm2, %v5026_v8  ;;  %v1729_v8 = vld [vmem:[#allocation3 + $0x18] sm:$0xff] }
 0x3ee   :  { %3127 = vmatpush3.bf16.xpose.msk.msra.mxu0 %vm3991_vm2, %v5027_v6  ;;  %v1746_v6 = vld [vmem:[#allocation3 + $0xa0] sm:$0xff] }
 0x3ef   :  { %3130 = vmatprep.subr.msk.bf16.mxu0 %vm3991_vm2, %v5028_v42  ;;  %v1747_v42 = vld [vmem:[#allocation3 + $0xa8] sm:$0xff] }
 0x3f0   :  { %v3158_v46 = vpack.c.bf16 %v1747_v42, %v1746_v6  ;;  %v1734_v6 = vld [vmem:[#allocation3 + $0x40] sm:$0xff]  ;;  %v1735_v42 = vld [vmem:[#allocation3 + $0x48] sm:$0xff] }
 0x3f6   :  { %3133 = vmatpush3.bf16.xpose.msk.msra.mxu0 %vm3991_vm2, %v5029_v17  ;;  %v3156_v17 = vpack.c.bf16 %v1729_v8, %v1728_v28  ;;  %v3166_v8 = vpack.c.bf16 %v1751_v22, %v1750_v34  ;;  %v1741_v34 = vld [vmem:[#allocation3 + $0x78] sm:$0xff] }
 0x3f7   :  { %v3180_v22 = vpack.c.bf16 %v1741_v34, %v1740_v2  ;;  %v5035_v2 = vld [vmem:[#allocation32_spill] sm:$0xff] }
 0x48c   :  { %v1086_v18 = vpop.f32.mrb[8].mxu1 }
 0x48d   :  { %v2762_v40 = vpop.f32.mrb[9].mxu1 }
 0x48e   :  { %v1749_v40 = vld [vmem:[#allocation3 + $0xb8] sm:$0xff] }
 0x490   :  { %v2477_v11 = vpop.f32.mrb[8].mxu0 }
 0x491   :  { %v2478_v21 = vpop.f32.mrb[9].mxu0 }
 0x492   :  { %v2479_v48 = vadd.f32 %v2478_v21, %v2477_v11  ;;  %v3182_v11 = vpack.c.bf16 %v1759_v55, %v1758_v53  ;;  %v1760_v21 = vld [vmem:[#allocation3 + $0x110] sm:$0xff] }
 0x493   :  { %v1736_v55 = vld [vmem:[#allocation3 + $0x50] sm:$0xff] }
 0x494   :  { %v1017_v57 = vadd.f32 1e-05, %v2479_v48  ;;  %v1761_v48 = vld [vmem:[#allocation3 + $0x118] sm:$0xff]  ;;  %3183 = vmatprep.subr.bf16.mxu0 %v3182_v11 }
 0x496   :  { %v1087_v58 = vadd.f32 %v1086_v18, %v1017_v57  ;;  %v1748_v18 = vld [vmem:[#allocation3 + $0xb0] sm:$0xff]  ;;  %v3160_v57 = vpack.c.bf16 %v1731_v0, %v1730_v32  ;;  %v1753_v32 = vld [vmem:[#allocation3 + $0xd8] sm:$0xff]  ;;  %v3168_v0 = vpack.c.bf16 %v1735_v42, %v1734_v6  ;;  %v5033_v42 = vld [vmem:[#allocation30_spill] sm:$0xff] }
 0x497   :  { %v3162_v39 = vpack.c.bf16 %v1749_v40, %v1748_v18  ;;  %v1737_v18 = vld [vmem:[#allocation3 + $0x58] sm:$0xff]  ;;  %v1754_v40 = vld [vmem:[#allocation3 + $0xe0] sm:$0xff] }
 0x498   :  { %3209 = vrsqrt.f32 %v1087_v58  ;;  %v1732_v58 = vld [vmem:[#allocation3 + $0x30] sm:$0xff] }
 0x499   :  { %v3164_v28 = vpack.c.bf16 %v1733_v43, %v1732_v58  ;;  %v1739_v58 = vld [vmem:[#allocation3 + $0x68] sm:$0xff] }
 0x4a2   :  { %v3210_v30 = vpop.eup %3209 }
 0x4a3   :  { %2521 = vmatprep.mubr.msk.f32.mxu0 %vm421_vm1, %v3210_v30  ;;  %2780 = vmatmul.mubr.msk.f32.vlgmr.msra.gmra.mrb[10].mxu1 %vm421_vm1, %v3210_v30 }
 0x4a4   :  { %2522 = vmatmul.mubr.msk.f32.vlgmr.msra.gmra.mrb[10].mxu0 %vm421_vm1, %v3210_v30  ;;  %3153 = vmatpush3.bf16.msra.mxu1 %v3152_v41  ;;  %v3186_v30 = vpack.c.bf16 %v1761_v48, %v1760_v21  ;;  %v1764_v41 = vld [vmem:[#allocation3 + $0x130] sm:$0xff]  ;;  %v3172_v21 = vpack.c.bf16 %v1737_v18, %v1736_v55 }
 0x4a5   :  { %3155 = vmatprep.subr.bf16.mxu1 %v3154_v50  ;;  %3185 = vmatpush3.bf16.msra.mxu0 %v3182_v11  ;;  %v1765_v50 = vld [vmem:[#allocation3 + $0x138] sm:$0xff]  ;;  %v1755_v11 = vld [vmem:[#allocation3 + $0xe8] sm:$0xff] }
 0x4a6   :  { %3187 = vmatprep.subr.bf16.mxu0 %v3186_v30  ;;  %v3174_v48 = vpack.c.bf16 %v1755_v11, %v1754_v40 }
 0x4a8   :  { %3157 = vmatpush3.bf16.msra.mxu1 %v3156_v17  ;;  %v1752_v17 = vld [vmem:[#allocation3 + $0xd0] sm:$0xff] }
 0x4a9   :  { %3159 = vmatprep.subr.bf16.mxu1 %v3158_v46  ;;  %3189 = vmatpush3.bf16.msra.mxu0 %v3186_v30  ;;  %v3194_v46 = vpack.c.bf16 %v1765_v50, %v1764_v41  ;;  %v3170_v53 = vpack.c.bf16 %v1753_v32, %v1752_v17  ;;  %v1756_v30 = vld [vmem:[#allocation3 + $0xf0] sm:$0xff]  ;;  %v134_v50 = vld [vmem:[%s4896_s1] sm:$0x7]  ;;  %s3434_s1 = smov 1  }
 0x4aa   :  { %3191 = vmatprep.subr.bf16.mxu0 %v3190_v56  ;;  %v1243_v17 = vrot.slane %v134_v50, %v5033_v42  ;;  %v135_v32 = vld [vmem:[%s4897_s2] sm:$0x7]  ;;  %s3435_s2 = smov 127  }
 0x4ac   :  { %3161 = vmatpush3.bf16.msra.mxu1 %v3160_v57  ;;  %v1738_v57 = vld [vmem:[#allocation3 + $0x60] sm:$0xff] }
 0x4ad   :  { %3163 = vmatprep.subr.bf16.mxu1 %v3162_v39  ;;  %3193 = vmatpush3.bf16.msra.mxu0 %v3190_v56  ;;  %v1757_v39 = vld [vmem:[#allocation3 + $0xf8] sm:$0xff]  ;;  %v3176_v43 = vpack.c.bf16 %v1739_v58, %v1738_v57  ;;  %v5031_v56 = vld [vmem:[#allocation28_spill] sm:$0xff] }
 0x4ae   :  { %3195 = vmatprep.subr.bf16.mxu0 %v3194_v46  ;;  %v3178_v52 = vpack.c.bf16 %v1757_v39, %v1756_v30  ;;  %v1246_v41 = vsub.s32 2, %v5031_v56  ;;  %v4501_v30 = vrot.slane %v135_v32, %v5033_v42  ;;  %v5036_v56 = vld [vmem:[#allocation33_spill] sm:$0xff] }
 0x4b0   :  { %3165 = vmatpush3.bf16.msra.mxu1 %v3164_v28  ;;  %v1247_v28 = vrot.slane %v134_v50, %v1246_v41 }
 0x4b1   :  { %3167 = vmatprep.subr.bf16.mxu1 %v3166_v8  ;;  %3197 = vmatpush3.bf16.msra.mxu0 %v3194_v46  ;;  %v5032_v8 = vld [vmem:[#allocation29_spill] sm:$0xff] }
 0x4b2   :  { %v1239_v6 = vrot.slane %v134_v50, %v5032_v8  ;;  %v4494_v57 = vrot.slane %v135_v32, %v5032_v8 }
 0x4b4   :  { %3169 = vmatpush3.bf16.msra.mxu1 %v3168_v0 }
 0x4b5   :  { %3171 = vmatprep.subr.bf16.mxu1 %v3170_v53 }
 0x4b8   :  { %3173 = vmatpush3.bf16.msra.mxu1 %v3172_v21  ;;  %v4489_v21 = vrot.slane %v135_v32, %v1246_v41 }
 0x4b9   :  { %3175 = vmatprep.subr.bf16.mxu1 %v3174_v48 }
 0x4bc   :  { %3177 = vmatpush3.bf16.msra.mxu1 %v3176_v43  ;;  %v5034_v43 = vld [vmem:[#allocation31_spill] sm:$0xff] }
 0x4bd   :  { %3179 = vmatprep.subr.bf16.mxu1 %v3178_v52 }
 0x4c0   :  { %3181 = vmatpush3.bf16.msra.mxu1 %v3180_v22 }
 0x576   :  { %v1231_v46 = vpop.f32.mrb[10].mxu1 }
 0x577   :  { %v1253_v0 = vmul.f32 %v1247_v28, %v1231_v46  ;;  %v1160_v53 = vpop.f32.mrb[10].mxu0  ;;  %v2781_v55 = vpop.f32.mrb[11].mxu1  ;;  %v5037_v46 = vld [vmem:[#allocation35_spill] sm:$0xff] }
 0x578   :  { %v4486_v18 = vmul.f32 %v1239_v6, %v1160_v53  ;;  %v1162_v40 = vpop.f32.mrb[11].mxu0 }
 0x579   :  { %v1265_v11 = vrot.slane %v1253_v0, %v5032_v8  ;;  %v4491_v48 = vmul.f32 %v1243_v17, %v1162_v40 }
 0x57a   :  { %v4498_v58 = vrot.slane %v4486_v18, %v5032_v8 }
 0x57b   :  { %v4505_v39 = vrot.slane %v4491_v48, %v5032_v8  ;;  %v1268_v52 = vmul.f32 %v1265_v11, %v5034_v43  ;;  %v1271_v34 = vmul.f32 %v1265_v11, %v5035_v2  ;;  %v1274_v22 = vmul.f32 %v1265_v11, %v4110_v10 }
 0x57c   :  { %v1266_v41 = vmul.f32 %v4498_v58, %v5036_v56  ;;  %v1277_v50 = vmul.f32 %v1265_v11, %v4114_v14  ;;  %v1280_v28 = vmul.f32 %v1265_v11, %v4165_v61  ;;  %v1283_v8 = vmul.f32 %v1265_v11, %v4175_v63 }
 0x57d   :  { %v4515_v6 = vadd.f32 %v4489_v21, %v1268_v52  ;;  %v4518_v17 = vadd.f32 %v4489_v21, %v1271_v34  ;;  %v1267_v32 = vmul.f32 %v4505_v39, %v4121_v5  ;;  %v1270_v53 = vmul.f32 %v4505_v39, %v5037_v46  ;;  %v5039_v46 = vld [vmem:[#allocation36_spill] sm:$0xff] }
 0x57e   :  { %v4525_v10 = vadd.f32 %v4489_v21, %v1274_v22  ;;  %v4528_v55 = vadd.f32 %v4494_v57, %v1266_v41  ;;  %v4531_v14 = vadd.f32 %v4489_v21, %v1277_v50  ;;  %v4534_v61 = vadd.f32 %v4489_v21, %v1280_v28  ;;  %v5038_v22 = vld [vmem:[#allocation34_spill] sm:$0xff] }
 0x57f   :  { %v2262_v40 = vmul.f32 -1.442695, %v4515_v6  ;;  %v2265_v43 = vmul.f32 -1.442695, %v4518_v17  ;;  %v4539_v5 = vadd.f32 %v4501_v30, %v1267_v32  ;;  %v4542_v52 = vadd.f32 %v4501_v30, %v1270_v53 }
 0x580   :  { %v2268_v2 = vmul.f32 -1.442695, %v4525_v10  ;;  %v2260_v34 = vmul.f32 -1.442695, %v4528_v55  ;;  %v1269_v56 = vmul.f32 %v4498_v58, %v5038_v22  ;;  %v2271_v28 = vmul.f32 -1.442695, %v4531_v14 }
 0x581   :  { %3211 = vpow2.f32 %v2262_v40  ;;  %v2261_v41 = vmul.f32 -1.442695, %v4539_v5  ;;  %v2264_v50 = vmul.f32 -1.442695, %v4542_v52  ;;  %v1273_v53 = vmul.f32 %v4505_v39, %v5039_v46 }
 0x582   :  { %3213 = vpow2.f32 %v2265_v43  ;;  %v4552_v32 = vadd.f32 %v4494_v57, %v1269_v56  ;;  %v2274_v38 = vmul.f32 -1.442695, %v4534_v61  ;;  %v1286_v40 = vmul.f32 %v1265_v11, %v4206_v26  ;;  %v5040_v56 = vld [vmem:[#allocation37_spill] sm:$0xff] }
 0x583   :  { %3215 = vpow2.f32 %v2261_v41  ;;  %v1272_v22 = vmul.f32 %v4498_v58, %v4150_v15  ;;  %v4562_v13 = vadd.f32 %v4501_v30, %v1273_v53  ;;  %v4565_v43 = vadd.f32 %v4489_v21, %v1283_v8 }
 0x584   :  { %3217 = vpow2.f32 %v2268_v2  ;;  %v1276_v46 = vmul.f32 %v4505_v39, %v5040_v56  ;;  %v2263_v63 = vmul.f32 -1.442695, %v4552_v32  ;;  %v4571_v41 = vadd.f32 %v4489_v21, %v1286_v40 }
 0x585   :  { %3219 = vpow2.f32 %v2260_v34  ;;  %v4574_v26 = vadd.f32 %v4494_v57, %v1272_v22  ;;  %v2267_v15 = vmul.f32 -1.442695, %v4562_v13  ;;  %v2277_v2 = vmul.f32 -1.442695, %v4565_v43 }
 0x586   :  { %3221 = vpow2.f32 %v2264_v50  ;;  %v1289_v8 = vmul.f32 %v1265_v11, %v4210_v20  ;;  %v4580_v53 = vrot.slane %v1253_v0, %v5033_v42  ;;  %v2280_v34 = vmul.f32 -1.442695, %v4571_v41 }
 0x587   :  { %3223 = vpow2.f32 %v2271_v28  ;;  %v2266_v40 = vmul.f32 -1.442695, %v4574_v26  ;;  %v4585_v22 = vadd.f32 %v4501_v30, %v1276_v46  ;;  %v4589_v28 = vrot.slane %v4486_v18, %v5033_v42 }
 0x588   :  { %3225 = vpow2.f32 %v2274_v38  ;;  %v4592_v20 = vadd.f32 %v4489_v21, %v1289_v8  ;;  %v4596_v38 = vrot.slane %v4491_v48, %v5033_v42  ;;  %v1344_v56 = vmul.f32 %v4580_v53, %v4243_v35 }
 0x589   :  { %3227 = vpow2.f32 %v2263_v63  ;;  %v4601_v18 = vmul.f32 -1.442695, %v4585_v22  ;;  %v1279_v42 = vmul.f32 %v4505_v39, %v4157_v1  ;;  %v1347_v48 = vmul.f32 %v4580_v53, %v4247_v4 }
 0x58a   :  { %3229 = vpow2.f32 %v2267_v15  ;;  %5041 = vst [vmem:[#allocation10_spill] sm:$0xff] %v4592_v20  ;;  %v1275_v15 = vmul.f32 %v4498_v58, %v4154_v7  ;;  %v1278_v1 = vmul.f32 %v4498_v58, %v4183_v59 }
 0x58b   :  { %v3212_v50 = vpop.eup %3211  ;;  %3231 = vpow2.f32 %v2277_v2 }
 0x58c   :  { %v3214_v0 = vpop.eup %3213  ;;  %v1536_v11 = vadd.f32 1.0, %v3212_v50  ;;  %3233 = vpow2.f32 %v2280_v34  ;;  %v1350_v50 = vmul.f32 %v4580_v53, %v4280_v44 }
 0x58d   :  { %v3216_v46 = vpop.eup %3215  ;;  %v1539_v63 = vadd.f32 1.0, %v3214_v0  ;;  %3235 = vpow2.f32 %v2266_v40  ;;  %v4610_v40 = vmul.f32 -1.442695, %v4592_v20 }
 0x58e   :  { %v3218_v2 = vpop.eup %3217  ;;  %3237 = vrcp.f32 %v1536_v11  ;;  %v1535_v8 = vadd.f32 1.0, %v3216_v46  ;;  %v4615_v11 = vadd.f32 %v1344_v56, %v4489_v21  ;;  %v1353_v56 = vmul.f32 %v4580_v53, %v4284_v37 }
 0x58f   :  { %v3220_v34 = vpop.eup %3219  ;;  %3239 = vrcp.f32 %v1539_v63  ;;  %v1542_v35 = vadd.f32 1.0, %v3218_v2  ;;  %v4620_v63 = vadd.f32 %v4494_v57, %v1275_v15  ;;  %v1282_v2 = vmul.f32 %v4505_v39, %v4161_v24 }
 0x590   :  { %v3222_v0 = vpop.eup %3221  ;;  %3241 = vrcp.f32 %v1535_v8  ;;  %v1534_v7 = vadd.f32 1.0, %v3220_v34  ;;  %5042 = vst [vmem:[#allocation15_spill] sm:$0xff] %v4615_v11  ;;  %v4625_v8 = vadd.f32 %v4501_v30, %v1279_v42  ;;  %v4633_v15 = vadd.f32 %v1350_v50, %v4489_v21 }
 0x591   :  { %v3224_v46 = vpop.eup %3223  ;;  %3243 = vrcp.f32 %v1542_v35  ;;  %v1538_v4 = vadd.f32 1.0, %v3222_v0  ;;  %5043 = vst [vmem:[#allocation16_spill] sm:$0xff] %v4620_v63  ;;  %v4630_v35 = vadd.f32 %v1347_v48, %v4489_v21  ;;  %v4637_v42 = vadd.f32 %v4494_v57, %v1278_v1 }
 0x592   :  { %v3226_v20 = vpop.eup %3225  ;;  %3245 = vrcp.f32 %v1534_v7  ;;  %v1545_v44 = vadd.f32 1.0, %v3224_v46  ;;  %5044 = vst [vmem:[#allocation13_spill] sm:$0xff] %v4625_v8  ;;  %5045 = vst [vmem:[#allocation14_spill] sm:$0xff] %v4633_v15  ;;  %v2286_v7 = vmul.f32 -1.442695, %v4615_v11 }
 0x593   :  { %v3228_v34 = vpop.eup %3227  ;;  %3247 = vrcp.f32 %v1538_v4  ;;  %v1548_v59 = vadd.f32 1.0, %v3226_v20  ;;  %v4640_v4 = vadd.f32 %v4501_v30, %v1282_v2  ;;  %v1356_v20 = vmul.f32 %v4580_v53, %v4317_v47 }
 0x594   :  { %v3230_v0 = vpop.eup %3229  ;;  %3249 = vrcp.f32 %v1545_v44  ;;  %v1537_v24 = vadd.f32 1.0, %v3228_v34  ;;  %v2269_v44 = vmul.f32 -1.442695, %v4620_v63  ;;  %v4646_v34 = vadd.f32 %v1353_v56, %v4489_v21 }
 0x595   :  { %v3232_v46 = vpop.eup %3231  ;;  %3251 = vrcp.f32 %v1548_v59  ;;  %v1541_v37 = vadd.f32 1.0, %v3230_v0  ;;  %v2273_v59 = vmul.f32 -1.442695, %v4625_v8  ;;  %v2289_v0 = vmul.f32 -1.442695, %v4630_v35 }
 0x596   :  { %v3234_v48 = vpop.eup %3233  ;;  %3253 = vrcp.f32 %v1537_v24  ;;  %v1551_v50 = vadd.f32 1.0, %v3232_v46  ;;  %v2292_v47 = vmul.f32 -1.442695, %v4633_v15  ;;  %v2272_v24 = vmul.f32 -1.442695, %v4637_v42 }
 0x597   :  { %v3236_v11 = vpop.eup %3235  ;;  %3255 = vrcp.f32 %v1541_v37  ;;  %v1554_v1 = vadd.f32 1.0, %v3234_v48  ;;  %v2276_v56 = vmul.f32 -1.442695, %v4640_v4  ;;  %v4655_v37 = vadd.f32 %v1356_v20, %v4489_v21 }
 0x598   :  { %v3238_v2 = vpop.eup %3237  ;;  %3257 = vrcp.f32 %v1551_v50  ;;  %v1540_v54 = vadd.f32 1.0, %v3236_v11  ;;  %v2295_v50 = vmul.f32 -1.442695, %v4646_v34  ;;  %v1281_v11 = vmul.f32 %v4498_v58, %v4187_v3 }
 0x599   :  { %v3240_v46 = vpop.eup %3239  ;;  %v1680_v63 = vmul.f32 %v3238_v2, %v4515_v6  ;;  %3259 = vrcp.f32 %v1554_v1  ;;  %v1285_v20 = vmul.f32 %v4505_v39, %v4192_v19  ;;  %v1359_v1 = vmul.f32 %v4580_v53, %v4321_v25 }
 0x59a   :  { %v3242_v48 = vpop.eup %3241  ;;  %v1683_v8 = vmul.f32 %v3240_v46, %v4518_v17  ;;  %3261 = vrcp.f32 %v1540_v54  ;;  %v1362_v3 = vmul.f32 %v4580_v53, %v4354_v29  ;;  %v2298_v25 = vmul.f32 -1.442695, %v4655_v37 }
 0x59b   :  { %v3244_v15 = vpop.eup %3243  ;;  %2798 = vmatprep.mubr.msk.f32.mxu0 %vm277_vm3, %v1680_v63  ;;  %v1679_v6 = vmul.f32 %v3242_v48, %v4539_v5  ;;  %3263 = vpow2.f32 %v4601_v18  ;;  %v1284_v5 = vmul.f32 %v4498_v58, %v4216_v27  ;;  %v1288_v63 = vmul.f32 %v4505_v39, %v4200_v23 }
 0x59c   :  { %v3246_v17 = vpop.eup %3245  ;;  %2799 = vmatmul.mubr.msk.f32.vlgmr.msra.gmra.mrb[12].mxu0 %vm277_vm3, %v1683_v8  ;;  %v1686_v54 = vmul.f32 %v3244_v15, %v4525_v10  ;;  %3265 = vpow2.f32 %v4610_v40  ;;  %v4682_v29 = vadd.f32 %v4494_v57, %v1281_v11  ;;  %v1365_v27 = vmul.f32 %v4580_v53, %v4358_v12 }
 0x59d   :  { %v3248_v18 = vpop.eup %3247  ;;  %1878 = vmatprep.mubr.f32.mxu1 %v1679_v6  ;;  %v1678_v19 = vmul.f32 %v3246_v17, %v4528_v55  ;;  %3267 = vpow2.f32 %v2286_v7  ;;  %v4688_v15 = vadd.f32 %v4501_v30, %v1285_v20  ;;  %v4691_v23 = vadd.f32 %v1359_v1, %v4489_v21 }
 0x59e   :  { %v3250_v8 = vpop.eup %3249  ;;  %2801 = vmatprep.mubr.msk.f32.mxu0 %vm277_vm3, %v1686_v54  ;;  %v1682_v10 = vmul.f32 %v3248_v18, %v4542_v52  ;;  %3269 = vpow2.f32 %v2269_v44  ;;  %v4695_v7 = vadd.f32 %v1362_v3, %v4489_v21  ;;  %v4698_v12 = vadd.f32 %v4494_v57, %v1284_v5 }
 0x59f   :  { %v3252_v40 = vpop.eup %3251  ;;  %1879 = vmatmul.mubr.f32.vlgmr.msra.gmra.mrb[12].mxu1 %v1678_v19  ;;  %v1689_v55 = vmul.f32 %v3250_v8, %v4531_v14  ;;  %3271 = vpow2.f32 %v2273_v59  ;;  %v4703_v44 = vadd.f32 %v4501_v30, %v1288_v63  ;;  %v1287_v59 = vmul.f32 %v4498_v58, %v4220_v31 }
 0x5a0   :  { %v3254_v39 = vpop.eup %3253  ;;  %1883 = vmatprep.mubr.f32.mxu1 %v1682_v10  ;;  %v1692_v52 = vmul.f32 %v3252_v40, %v4534_v61  ;;  %3273 = vpow2.f32 %v2289_v0  ;;  %v2275_v2 = vmul.f32 -1.442695, %v4682_v29  ;;  %v4711_v46 = vadd.f32 %v1365_v27, %v4489_v21 }
 0x5a1   :  { %v3256_v53 = vpop.eup %3255  ;;  %2802 = vmatmul.mubr.msk.f32.gmra.mrb[14].mxu0 %vm277_vm3, %v1689_v55  ;;  %v1681_v14 = vmul.f32 %v3254_v39, %v4552_v32  ;;  %3275 = vpow2.f32 %v2292_v47  ;;  %v2279_v47 = vmul.f32 -1.442695, %v4688_v15  ;;  %v4716_v31 = vmul.f32 -1.442695, %v4691_v23 }
 0x5a2   :  { %v3258_v61 = vpop.eup %3257  ;;  %2804 = vmatprep.mubr.msk.f32.mxu0 %vm277_vm3, %v1692_v52  ;;  %v1685_v0 = vmul.f32 %v3256_v53, %v4562_v13  ;;  %3277 = vpow2.f32 %v2272_v24  ;;  %v4720_v24 = vmul.f32 -1.442695, %v4695_v7  ;;  %v4723_v21 = vmul.f32 -1.442695, %v4698_v12 }
 0x5a3   :  { %v3260_v48 = vpop.eup %3259  ;;  %1884 = vmatmul.mubr.f32.gmra.mrb[14].mxu1 %v1681_v14  ;;  %v1695_v32 = vmul.f32 %v3258_v61, %v4565_v43  ;;  %3279 = vpow2.f32 %v2276_v56  ;;  %v4728_v56 = vmul.f32 -1.442695, %v4703_v44  ;;  %v4731_v6 = vadd.f32 %v4494_v57, %v1287_v59 }
 0x5a4   :  { %v3262_v58 = vpop.eup %3261  ;;  %1888 = vmatprep.mubr.f32.mxu1 %v1685_v0  ;;  %v1698_v13 = vmul.f32 %v3260_v48, %v4571_v41  ;;  %3281 = vpow2.f32 %v2295_v50  ;;  %v4735_v20 = vmul.f32 -1.442695, %v4711_v46  ;;  %v1349_v1 = vmul.f32 %v4596_v38, %v4265_v9  ;;  %v5046_v48 = vld [vmem:[#allocation11_spill] sm:$0xff] }
 0x5a5   :  { %v3264_v11 = vpop.eup %3263  ;;  %2805 = vmatmul.mubr.msk.f32.gmra.mrb[16].mxu0 %vm277_vm3, %v1695_v32  ;;  %v1684_v43 = vmul.f32 %v3262_v58, %v4574_v26  ;;  %3283 = vpow2.f32 %v2298_v25  ;;  %v1348_v54 = vmul.f32 %v4589_v28, %v4290_v45  ;;  %v1352_v3 = vmul.f32 %v4596_v38, %v4274_v49 }
 0x5a6   :  { %v3266_v41 = vpop.eup %3265  ;;  %2807 = vmatprep.mubr.msk.f32.mxu0 %vm277_vm3, %v1698_v13  ;;  %v1544_v50 = vadd.f32 1.0, %v3264_v11  ;;  %3285 = vpow2.f32 %v2275_v2  ;;  %v4744_v19 = vadd.f32 %v1349_v1, %v4501_v30  ;;  %v1351_v25 = vmul.f32 %v4589_v28, %v4294_v16  ;;  %v5048_v11 = vld [vmem:[#allocation12_spill] sm:$0xff] }
 0x5a7   :  { %v3268_v17 = vpop.eup %3267  ;;  %1889 = vmatmul.mubr.f32.gmra.mrb[16].mxu1 %v1684_v43  ;;  %v1557_v26 = vadd.f32 1.0, %v3266_v41  ;;  %3287 = vpow2.f32 %v2279_v47  ;;  %v4749_v8 = vadd.f32 %v1348_v54, %v4494_v57  ;;  %v4752_v45 = vadd.f32 %v1352_v3, %v4501_v30  ;;  %v5047_v47 = vld [vmem:[#allocation6_spill] sm:$0xff] }
 0x5a8   :  { %v3270_v5 = vpop.eup %3269  ;;  %3289 = vrcp.f32 %v1544_v50  ;;  %v1560_v18 = vadd.f32 1.0, %v3268_v17  ;;  %v4755_v27 = vmul.f32 -1.442695, %v4731_v6  ;;  %v4758_v40 = vadd.f32 %v1351_v25, %v4494_v57  ;;  %v5049_v25 = vld [vmem:[#allocation38_spill] sm:$0xff] }
 0x5a9   :  { %v3272_v9 = vpop.eup %3271  ;;  %3291 = vrcp.f32 %v1557_v26  ;;  %v1543_v63 = vadd.f32 1.0, %v3270_v5  ;;  %v1343_v39 = vmul.f32 %v4596_v38, %v4228_v62  ;;  %v1342_v52 = vmul.f32 %v4589_v28, %v4253_v36 }
 0x5aa   :  { %v3274_v10 = vpop.eup %3273  ;;  %3293 = vrcp.f32 %v1560_v18  ;;  %v1547_v49 = vadd.f32 1.0, %v3272_v9  ;;  %v1346_v59 = vmul.f32 %v4596_v38, %v4237_v60  ;;  %v1355_v61 = vmul.f32 %v4596_v38, %v4302_v33 }
 0x5ab   :  { %v3276_v55 = vpop.eup %3275  ;;  %3295 = vrcp.f32 %v1543_v63  ;;  %v1563_v16 = vadd.f32 1.0, %v3274_v10  ;;  %v1354_v32 = vmul.f32 %v4589_v28, %v5046_v48  ;;  %v1358_v62 = vmul.f32 %v4596_v38, %v5047_v47 }
 0x5ac   :  { %v3278_v53 = vpop.eup %3277  ;;  %3297 = vrcp.f32 %v1547_v49  ;;  %v1566_v14 = vadd.f32 1.0, %v3276_v55  ;;  %v4773_v13 = vadd.f32 %v1355_v61, %v4501_v30  ;;  %v1357_v60 = vmul.f32 %v4589_v28, %v5048_v11  ;;  %v5055_v11 = vld [vmem:[#allocation16_spill] sm:$0xff] }
 0x5ad   :  { %v3280_v0 = vpop.eup %3279  ;;  %3299 = vrcp.f32 %v1563_v16  ;;  %v1546_v2 = vadd.f32 1.0, %v3278_v53  ;;  %v4778_v41 = vadd.f32 %v1354_v32, %v4494_v57  ;;  %v4781_v50 = vadd.f32 %v1358_v62, %v4501_v30  ;;  %v5050_v53 = vld [vmem:[#allocation8_spill] sm:$0xff]  ;;  %v5053_v32 = vld [vmem:[#allocation9_spill] sm:$0xff] }
 0x5ae   :  { %v3282_v58 = vpop.eup %3281  ;;  %3301 = vrcp.f32 %v1566_v14  ;;  %v1550_v36 = vadd.f32 1.0, %v3280_v0  ;;  %v4784_v26 = vadd.f32 %v1343_v39, %v4501_v30  ;;  %v4787_v54 = vadd.f32 %v1357_v60, %v4494_v57  ;;  %v5051_v14 = vld [vmem:[#allocation7_spill] sm:$0xff] }
 0x5af   :  { %v3284_v43 = vpop.eup %3283  ;;  %3303 = vrcp.f32 %v1546_v2  ;;  %v1569_v33 = vadd.f32 1.0, %v3282_v58  ;;  %v4790_v18 = vadd.f32 %v1342_v52, %v4494_v57  ;;  %v1345_v9 = vmul.f32 %v4589_v28, %v5049_v25  ;;  %v5052_v2 = vld [vmem:[#allocation10_spill] sm:$0xff] }
 0x5b0   :  { %v3286_v1 = vpop.eup %3285  ;;  %3305 = vrcp.f32 %v1550_v36  ;;  %v1572_v17 = vadd.f32 1.0, %v3284_v43  ;;  %v4795_v49 = vadd.f32 %v1346_v59, %v4501_v30  ;;  %v1361_v55 = vmul.f32 %v4596_v38, %v4339_v51 }
 0x5b1   :  { %v3288_v3 = vpop.eup %3287  ;;  %3307 = vrcp.f32 %v1569_v33  ;;  %v1549_v5 = vadd.f32 1.0, %v3286_v1  ;;  %v1360_v52 = vmul.f32 %v4589_v28, %v5050_v53  ;;  %v1364_v61 = vmul.f32 %v4596_v38, %v5051_v14  ;;  %v5056_v33 = vld [vmem:[#allocation13_spill] sm:$0xff] }
 0x5b2   :  { %v3290_v63 = vpop.eup %3289  ;;  %3309 = vrcp.f32 %v1572_v17  ;;  %v1553_v10 = vadd.f32 1.0, %v3288_v3  ;;  %v4806_v59 = vadd.f32 %v1361_v55, %v4501_v30  ;;  %v1363_v51 = vmul.f32 %v4589_v28, %v5053_v32 }
 0x5b3   :  { %v3292_v16 = vpop.eup %3291  ;;  %v1688_v39 = vmul.f32 %v3290_v63, %v4585_v22  ;;  %3311 = vrcp.f32 %v1549_v5  ;;  %v5054_v22 = vld [vmem:[#allocation15_spill] sm:$0xff]  ;;  %v4813_v58 = vadd.f32 %v1360_v52, %v4494_v57  ;;  %v4816_v38 = vadd.f32 %v1364_v61, %v4501_v30 }
 0x5b4   :  { %v3294_v0 = vpop.eup %3293  ;;  %v1701_v48 = vmul.f32 %v3292_v16, %v5052_v2  ;;  %3313 = vrcp.f32 %v1553_v10  ;;  %v4822_v28 = vadd.f32 %v1345_v9, %v4494_v57  ;;  %v4825_v43 = vadd.f32 %v1363_v51, %v4494_v57  ;;  %v5057_v57 = vld [vmem:[#allocation14_spill] sm:$0xff] }
 0x5b5   :  { %v3296_v47 = vpop.eup %3295  ;;  %1893 = vmatprep.mubr.f32.mxu1 %v1688_v39  ;;  %v1704_v62 = vmul.f32 %v3294_v0, %v5054_v22  ;;  %3315 = vpow2.f32 %v4716_v31  ;;  %v2285_v30 = vmul.f32 -1.442695, %v4784_v26  ;;  %v2288_v9 = vmul.f32 -1.442695, %v4795_v49 }
 0x5b6   :  { %v3298_v36 = vpop.eup %3297  ;;  %2808 = vmatmul.mubr.msk.f32.gmra.mrb[18].mxu0 %vm277_vm3, %v1701_v48  ;;  %v1687_v60 = vmul.f32 %v3296_v47, %v5055_v11  ;;  %3317 = vpow2.f32 %v4720_v24  ;;  %v2284_v24 = vmul.f32 -1.442695, %v4790_v18  ;;  %v2291_v55 = vmul.f32 -1.442695, %v4744_v19 }
 0x5b7   :  { %v3300_v31 = vpop.eup %3299  ;;  %2810 = vmatprep.mubr.msk.f32.mxu0 %vm277_vm3, %v1704_v62  ;;  %v1691_v1 = vmul.f32 %v3298_v36, %v5056_v33  ;;  %3319 = vpow2.f32 %v4723_v21  ;;  %v2290_v39 = vmul.f32 -1.442695, %v4749_v8  ;;  %v2294_v53 = vmul.f32 -1.442695, %v4752_v45 }
 0x5b8   :  { %v3302_v17 = vpop.eup %3301  ;;  %1894 = vmatmul.mubr.f32.gmra.mrb[18].mxu1 %v1687_v60  ;;  %v1707_v3 = vmul.f32 %v3300_v31, %v4630_v35  ;;  %3321 = vpow2.f32 %v4728_v56  ;;  %v2287_v35 = vmul.f32 -1.442695, %v4822_v28 }
 0x5b9   :  { %v3304_v5 = vpop.eup %3303  ;;  %1898 = vmatprep.mubr.f32.mxu1 %v1691_v1  ;;  %v1710_v25 = vmul.f32 %v3302_v17, %v5057_v57  ;;  %3323 = vpow2.f32 %v4735_v20 }
 0x5ba   :  { %v3306_v63 = vpop.eup %3305  ;;  %2811 = vmatmul.mubr.msk.f32.gmra.mrb[20].mxu0 %vm277_vm3, %v1707_v3  ;;  %v1690_v21 = vmul.f32 %v3304_v5, %v4637_v42  ;;  %3325 = vpow2.f32 %v4755_v27 }
 0x5bb   :  { %v3308_v56 = vpop.eup %3307  ;;  %2813 = vmatprep.mubr.msk.f32.mxu0 %vm277_vm3, %v1710_v25  ;;  %v1694_v10 = vmul.f32 %v3306_v63, %v4640_v4  ;;  %3327 = vpow2.f32 %v2285_v30  ;;  %v2293_v25 = vmul.f32 -1.442695, %v4758_v40 }
 0x5bc   :  { %v3310_v20 = vpop.eup %3309  ;;  %1899 = vmatmul.mubr.f32.gmra.mrb[20].mxu1 %v1690_v21  ;;  %v1713_v16 = vmul.f32 %v3308_v56, %v4646_v34  ;;  %3329 = vpow2.f32 %v2284_v24  ;;  %v2297_v21 = vmul.f32 -1.442695, %v4773_v13 }
 0x5bd   :  { %v3312_v42 = vpop.eup %3311  ;;  %1903 = vmatprep.mubr.f32.mxu1 %v1694_v10  ;;  %v1716_v27 = vmul.f32 %v3310_v20, %v4655_v37  ;;  %3331 = vpow2.f32 %v2288_v9  ;;  %v2296_v10 = vmul.f32 -1.442695, %v4778_v41 }
 0x5be   :  { %v3314_v52 = vpop.eup %3313  ;;  %2814 = vmatmul.mubr.msk.f32.gmra.mrb[22].mxu0 %vm277_vm3, %v1713_v16  ;;  %v1693_v4 = vmul.f32 %v3312_v42, %v4682_v29  ;;  %3333 = vpow2.f32 %v2287_v35  ;;  %v2300_v16 = vmul.f32 -1.442695, %v4781_v50 }
 0x5bf   :  { %v3316_v14 = vpop.eup %3315  ;;  %2816 = vmatprep.mubr.msk.f32.mxu0 %vm277_vm3, %v1716_v27  ;;  %v1697_v34 = vmul.f32 %v3314_v52, %v4688_v15  ;;  %3335 = vpow2.f32 %v2291_v55  ;;  %v2299_v27 = vmul.f32 -1.442695, %v4787_v54  ;;  %v2303_v52 = vmul.f32 -1.442695, %v4806_v59 }
 0x5c0   :  { %v3318_v61 = vpop.eup %3317  ;;  %1904 = vmatmul.mubr.f32.gmra.mrb[22].mxu1 %v1693_v4  ;;  %v1575_v0 = vadd.f32 1.0, %v3316_v14  ;;  %3337 = vpow2.f32 %v2290_v39  ;;  %v2302_v14 = vmul.f32 -1.442695, %v4813_v58 }
 0x5c1   :  { %v3320_v37 = vpop.eup %3319  ;;  %1908 = vmatprep.mubr.f32.mxu1 %v1697_v34  ;;  %v1578_v2 = vadd.f32 1.0, %v3318_v61  ;;  %3339 = vpow2.f32 %v2294_v53 }
 0x5c2   :  { %v3322_v48 = vpop.eup %3321  ;;  %3341 = vrcp.f32 %v1575_v0  ;;  %v1552_v32 = vadd.f32 1.0, %v3320_v37 }
 0x5c3   :  { %v3324_v51 = vpop.eup %3323  ;;  %3343 = vrcp.f32 %v1578_v2  ;;  %v1556_v29 = vadd.f32 1.0, %v3322_v48 }
 0x5c4   :  { %v3326_v47 = vpop.eup %3325  ;;  %3345 = vrcp.f32 %v1552_v32  ;;  %v1581_v22 = vadd.f32 1.0, %v3324_v51 }
 0x5c5   :  { %v3328_v62 = vpop.eup %3327  ;;  %3347 = vrcp.f32 %v1556_v29  ;;  %v1555_v15 = vadd.f32 1.0, %v3326_v47 }
 0x5c6   :  { %v3330_v36 = vpop.eup %3329  ;;  %3349 = vrcp.f32 %v1581_v22  ;;  %v1559_v11 = vadd.f32 1.0, %v3328_v62 }
 0x5c7   :  { %v3332_v60 = vpop.eup %3331  ;;  %3351 = vrcp.f32 %v1555_v15  ;;  %v1558_v31 = vadd.f32 1.0, %v3330_v36 }
 0x5c8   :  { %v3334_v33 = vpop.eup %3333  ;;  %3353 = vrcp.f32 %v1559_v11  ;;  %v1562_v1 = vadd.f32 1.0, %v3332_v60 }
 0x5c9   :  { %v3336_v30 = vpop.eup %3335  ;;  %3355 = vrcp.f32 %v1558_v31  ;;  %v1561_v17 = vadd.f32 1.0, %v3334_v33 }
 0x5ca   :  { %v3338_v3 = vpop.eup %3337  ;;  %3357 = vrcp.f32 %v1562_v1  ;;  %v1565_v24 = vadd.f32 1.0, %v3336_v30 }
 0x5cb   :  { %v3340_v5 = vpop.eup %3339  ;;  %3359 = vrcp.f32 %v1561_v17  ;;  %v1564_v57 = vadd.f32 1.0, %v3338_v3 }
 0x5cc   :  { %v3342_v9 = vpop.eup %3341  ;;  %3361 = vrcp.f32 %v1565_v24  ;;  %v1568_v63 = vadd.f32 1.0, %v3340_v5 }
 0x5cd   :  { %v3344_v35 = vpop.eup %3343  ;;  %v1719_v56 = vmul.f32 %v3342_v9, %v4691_v23  ;;  %3363 = vrcp.f32 %v1564_v57 }
 0x5ce   :  { %v3346_v55 = vpop.eup %3345  ;;  %v1722_v20 = vmul.f32 %v3344_v35, %v4695_v7  ;;  %3365 = vrcp.f32 %v1568_v63 }
 0x5cf   :  { %v3348_v39 = vpop.eup %3347  ;;  %2817 = vmatmul.mubr.msk.f32.gmra.mrb[24].mxu0 %vm277_vm3, %v1719_v56  ;;  %v1696_v42 = vmul.f32 %v3346_v55, %v4698_v12  ;;  %3367 = vpow2.f32 %v2293_v25  ;;  %v2306_v12 = vmul.f32 -1.442695, %v4816_v38 }
 0x5d0   :  { %v3350_v53 = vpop.eup %3349  ;;  %2819 = vmatprep.mubr.msk.f32.mxu0 %vm277_vm3, %v1722_v20  ;;  %v1700_v23 = vmul.f32 %v3348_v39, %v4703_v44  ;;  %3369 = vpow2.f32 %v2297_v21 }
 0x5d1   :  { %v3352_v7 = vpop.eup %3351  ;;  %1909 = vmatmul.mubr.f32.gmra.mrb[24].mxu1 %v1696_v42  ;;  %v1725_v4 = vmul.f32 %v3350_v53, %v4711_v46  ;;  %3371 = vpow2.f32 %v2296_v10  ;;  %v2305_v46 = vmul.f32 -1.442695, %v4825_v43 }
 0x5d2   :  { %v3354_v34 = vpop.eup %3353  ;;  %1913 = vmatprep.mubr.f32.mxu1 %v1700_v23  ;;  %3373 = vpow2.f32 %v2300_v16  ;;  %v1699_v44 = vmul.f32 %v3352_v7, %v4731_v6  ;;  %v3433_v23 = vmov 0  }
 0x5d3   :  { %v3356_v61 = vpop.eup %3355  ;;  %2820 = vmatmul.mubr.msk.f32.gmra.mrb[26].mxu0 %vm277_vm3, %v1725_v4  ;;  %3375 = vpow2.f32 %v2299_v27  ;;  %v1703_v37 = vmul.f32 %v3354_v34, %v4784_v26  ;;  %3207 = vset.pattern.permute.xlu1 %v3433_v23 }
 0x5d4   :  { %v3358_v0 = vpop.eup %3357  ;;  %3377 = vpow2.f32 %v2303_v52  ;;  %v1702_v51 = vmul.f32 %v3356_v61, %v4790_v18 }
 0x5d5   :  { %v3360_v2 = vpop.eup %3359  ;;  %1914 = vmatmul.mubr.f32.gmra.mrb[26].mxu1 %v1699_v44  ;;  %3379 = vpow2.f32 %v2302_v14  ;;  %v1706_v47 = vmul.f32 %v3358_v0, %v4795_v49 }
 0x5d6   :  { %v3362_v48 = vpop.eup %3361  ;;  %1918 = vmatprep.mubr.f32.mxu1 %v1703_v37  ;;  %3381 = vpow2.f32 %v2306_v12  ;;  %v1705_v15 = vmul.f32 %v3360_v2, %v4822_v28 }
 0x5d7   :  { %v3364_v32 = vpop.eup %3363  ;;  %3383 = vpow2.f32 %v2305_v46  ;;  %v1709_v60 = vmul.f32 %v3362_v48, %v4744_v19 }
 0x5d8   :  { %v3366_v29 = vpop.eup %3365  ;;  %v1708_v17 = vmul.f32 %v3364_v32, %v4749_v8 }
 0x5d9   :  { %v3368_v6 = vpop.eup %3367  ;;  %1919 = vmatmul.mubr.f32.gmra.mrb[28].mxu1 %v1702_v51  ;;  %v1712_v24 = vmul.f32 %v3366_v29, %v4752_v45 }
 0x5da   :  { %v3370_v22 = vpop.eup %3369  ;;  %1923 = vmatprep.mubr.f32.mxu1 %v1706_v47  ;;  %v1567_v26 = vadd.f32 1.0, %v3368_v6 }
 0x5db   :  { %v3372_v62 = vpop.eup %3371  ;;  %v1571_v36 = vadd.f32 1.0, %v3370_v22 }
 0x5dc   :  { %v3374_v11 = vpop.eup %3373  ;;  %3385 = vrcp.f32 %v1567_v26  ;;  %v1570_v31 = vadd.f32 1.0, %v3372_v62 }
 0x5dd   :  { %v3376_v33 = vpop.eup %3375  ;;  %1924 = vmatmul.mubr.f32.gmra.mrb[30].mxu1 %v1705_v15  ;;  %3387 = vrcp.f32 %v1571_v36  ;;  %v1574_v18 = vadd.f32 1.0, %v3374_v11 }
 0x5de   :  { %v3378_v49 = vpop.eup %3377  ;;  %1928 = vmatprep.mubr.f32.mxu1 %v1709_v60  ;;  %3389 = vrcp.f32 %v1570_v31  ;;  %v1573_v1 = vadd.f32 1.0, %v3376_v33 }
 0x5df   :  { %v3380_v30 = vpop.eup %3379  ;;  %3391 = vrcp.f32 %v1574_v18  ;;  %v1577_v3 = vadd.f32 1.0, %v3378_v49 }
 0x5e0   :  { %v3382_v28 = vpop.eup %3381  ;;  %3393 = vrcp.f32 %v1573_v1  ;;  %v1576_v19 = vadd.f32 1.0, %v3380_v30 }
 0x5e1   :  { %1929 = vmatmul.mubr.f32.gmra.mrb[32].mxu1 %v1708_v17  ;;  %v3384_v5 = vpop.eup %3383  ;;  %3395 = vrcp.f32 %v1577_v3  ;;  %v1580_v57 = vadd.f32 1.0, %v3382_v28 }
 0x5e2   :  { %1933 = vmatprep.mubr.f32.mxu1 %v1712_v24  ;;  %3397 = vrcp.f32 %v1576_v19  ;;  %v1579_v9 = vadd.f32 1.0, %v3384_v5 }
 0x5e3   :  { %3399 = vrcp.f32 %v1580_v57 }
 0x5e4   :  { %3401 = vrcp.f32 %v1579_v9 }
 0x5e6   :  { %v3386_v25 = vpop.eup %3385 }
 0x5e7   :  { %v3388_v63 = vpop.eup %3387  ;;  %v1711_v21 = vmul.f32 %v3386_v25, %v4758_v40 }
 0x5e8   :  { %v3390_v8 = vpop.eup %3389  ;;  %v1715_v35 = vmul.f32 %v3388_v63, %v4773_v13 }
 0x5e9   :  { %v3392_v56 = vpop.eup %3391  ;;  %1934 = vmatmul.mubr.f32.gmra.mrb[34].mxu1 %v1711_v21  ;;  %v1714_v45 = vmul.f32 %v3390_v8, %v4778_v41 }
 0x5ea   :  { %1938 = vmatprep.mubr.f32.mxu1 %v1715_v35  ;;  %v3394_v10 = vpop.eup %3393  ;;  %v1718_v55 = vmul.f32 %v3392_v56, %v4781_v50  ;;  %v2157_v50 = vld [vmem:[#allocation2] sm:$0x1] }
 0x5eb   :  { %v3396_v20 = vpop.eup %3395  ;;  %v1717_v16 = vmul.f32 %v3394_v10, %v4787_v54  ;;  %2160 = vperm.xlu1 %3207, %v2157_v50  }
 0x5ec   :  { %v3398_v39 = vpop.eup %3397  ;;  %v1721_v40 = vmul.f32 %v3396_v20, %v4806_v59 }
 0x5ed   :  { %1939 = vmatmul.mubr.f32.gmra.mrb[36].mxu1 %v1714_v45  ;;  %v3400_v42 = vpop.eup %3399  ;;  %v1720_v13 = vmul.f32 %v3398_v39, %v4813_v58 }
 0x5ee   :  { %1943 = vmatprep.mubr.f32.mxu1 %v1718_v55  ;;  %v3402_v27 = vpop.eup %3401  ;;  %v1724_v53 = vmul.f32 %v3400_v42, %v4816_v38 }
 0x5ef   :  { %v1723_v41 = vmul.f32 %v3402_v27, %v4825_v43 }
 0x5f1   :  { %1944 = vmatmul.mubr.f32.gmra.mrb[38].mxu1 %v1717_v16 }
 0x5f2   :  { %1948 = vmatprep.mubr.f32.mxu1 %v1721_v40 }
 0x5f5   :  { %1949 = vmatmul.mubr.f32.gmra.mrb[40].mxu1 %v1720_v13 }
 0x5f6   :  { %1953 = vmatprep.mubr.f32.mxu1 %v1724_v53 }
 0x5f9   :  { %1954 = vmatmul.mubr.f32.gmra.mrb[42].mxu1 %v1723_v41 }
 0x66f   :  { %v2800_v54 = vpop.f32.mrb[12].mxu0 }
 0x670   :  { %v2025_v59 = vpop.f32.mrb[13].mxu0 }
 0x672   :  { %v2564_v52 = vpop.f32.mrb[12].mxu1 }
 0x673   :  { %v2565_v7 = vpop.f32.mrb[13].mxu1 }
 0x674   :  { %v2566_v4 = vadd.f32 %v2565_v7, %v2564_v52  ;;  %v2803_v14 = vpop.f32.mrb[14].mxu0 }
 0x675   :  { %v2035_v58 = vpop.f32.mrb[15].mxu0 }
 0x676   :  { %v2567_v34 = vpop.f32.mrb[14].mxu1  ;;  %v2026_v12 = vadd.f32 %v2566_v4, %v2025_v59 }
 0x677   :  { %v2568_v38 = vpop.f32.mrb[15].mxu1 }
 0x678   :  { %v2569_v61 = vadd.f32 %v2568_v38, %v2567_v34  ;;  %v2806_v44 = vpop.f32.mrb[16].mxu0  ;;  %2104 = vxpose.xlu0.b32.start [1/16] (narrow) %v2026_v12, 8 }
 0x679   :  { %v2045_v43 = vpop.f32.mrb[17].mxu0 }
 0x67a   :  { %v2570_v0 = vpop.f32.mrb[16].mxu1  ;;  %v2031_v37 = vadd.f32 %v2800_v54, %v2569_v61 }
 0x67b   :  { %v2571_v2 = vpop.f32.mrb[17].mxu1 }
 0x67c   :  { %v2572_v46 = vadd.f32 %v2571_v2, %v2570_v0  ;;  %2105 = vxpose.xlu0.b32.cont [2/16] (narrow) %v2031_v37, 8 }
 0x67e   :  { %v2036_v48 = vadd.f32 %v2572_v46, %v2035_v58 }
 0x680   :  { %2106 = vxpose.xlu0.b32.cont [3/16] (narrow) %v2036_v48, 8 }
 0x689   :  { %v2809_v32 = vpop.f32.mrb[18].mxu0 }
 0x68a   :  { %v2055_v51 = vpop.f32.mrb[19].mxu0 }
 0x68b   :  { %v2573_v29 = vpop.f32.mrb[18].mxu1 }
 0x68c   :  { %v2574_v47 = vpop.f32.mrb[19].mxu1 }
 0x68d   :  { %v2575_v6 = vadd.f32 %v2574_v47, %v2573_v29  ;;  %v2812_v22 = vpop.f32.mrb[20].mxu0  ;;  %v2136_v29 = vld [vmem:[%s4900_s5] sm:$0x7] }
 0x68e   :  { %v2065_v26 = vpop.f32.mrb[21].mxu0 }
 0x68f   :  { %v2576_v62 = vpop.f32.mrb[20].mxu1  ;;  %v2041_v15 = vadd.f32 %v2803_v14, %v2575_v6 }
 0x690   :  { %v2577_v36 = vpop.f32.mrb[21].mxu1 }
 0x691   :  { %v2578_v11 = vadd.f32 %v2577_v36, %v2576_v62  ;;  %v2815_v60 = vpop.f32.mrb[22].mxu0  ;;  %2107 = vxpose.xlu0.b32.cont [4/16] (narrow) %v2041_v15, 8 }
 0x692   :  { %v2075_v31 = vpop.f32.mrb[23].mxu0 }
 0x693   :  { %v2579_v33 = vpop.f32.mrb[22].mxu1  ;;  %v2046_v18 = vadd.f32 %v2578_v11, %v2045_v43 }
 0x694   :  { %v2580_v49 = vpop.f32.mrb[23].mxu1 }
 0x695   :  { %v2581_v1 = vadd.f32 %v2580_v49, %v2579_v33  ;;  %2108 = vxpose.xlu0.b32.cont [5/16] (narrow) %v2046_v18, 8 }
 0x697   :  { %v2051_v30 = vadd.f32 %v2806_v44, %v2581_v1 }
 0x699   :  { %2109 = vxpose.xlu0.b32.cont [6/16] (narrow) %v2051_v30, 8 }
 0x6a2   :  { %v2818_v17 = vpop.f32.mrb[24].mxu0 }
 0x6a3   :  { %v2085_v3 = vpop.f32.mrb[25].mxu0 }
 0x6a4   :  { %v2582_v28 = vpop.f32.mrb[24].mxu1 }
 0x6a5   :  { %v2583_v24 = vpop.f32.mrb[25].mxu1 }
 0x6a6   :  { %v2584_v19 = vadd.f32 %v2583_v24, %v2582_v28  ;;  %v2821_v5 = vpop.f32.mrb[26].mxu0 }
 0x6a7   :  { %v2095_v57 = vpop.f32.mrb[27].mxu0 }
 0x6a8   :  { %v2585_v25 = vpop.f32.mrb[26].mxu1  ;;  %v2056_v9 = vadd.f32 %v2584_v19, %v2055_v51  ;;  %v2161_v51 = vpop.permute.xlu1 %2160 }
 0x6a9   :  { %v2586_v63 = vpop.f32.mrb[27].mxu1 }
 0x6aa   :  { %v2587_v21 = vadd.f32 %v2586_v63, %v2585_v25  ;;  %2110 = vxpose.xlu0.b32.cont [7/16] (narrow) %v2056_v9, 8 }
 0x6ac   :  { %v2588_v8 = vpop.f32.mrb[28].mxu1  ;;  %v2061_v35 = vadd.f32 %v2809_v32, %v2587_v21 }
 0x6ad   :  { %v2589_v56 = vpop.f32.mrb[29].mxu1 }
 0x6ae   :  { %v2590_v45 = vadd.f32 %v2589_v56, %v2588_v8  ;;  %2111 = vxpose.xlu0.b32.cont [8/16] (narrow) %v2061_v35, 8 }
 0x6b0   :  { %v2591_v10 = vpop.f32.mrb[30].mxu1  ;;  %v2066_v55 = vadd.f32 %v2590_v45, %v2065_v26 }
 0x6b1   :  { %v2592_v20 = vpop.f32.mrb[31].mxu1 }
 0x6b2   :  { %v2593_v16 = vadd.f32 %v2592_v20, %v2591_v10  ;;  %2112 = vxpose.xlu0.b32.cont [9/16] (narrow) %v2066_v55, 8 }
 0x6b4   :  { %v2594_v39 = vpop.f32.mrb[32].mxu1  ;;  %v2071_v40 = vadd.f32 %v2812_v22, %v2593_v16  ;;  %v2150_v22 = vrot.slane %v2136_v29, 2 }
 0x6b5   :  { %v2595_v42 = vpop.f32.mrb[33].mxu1 }
 0x6b6   :  { %v2596_v13 = vadd.f32 %v2595_v42, %v2594_v39  ;;  %2113 = vxpose.xlu0.b32.cont [10/16] (narrow) %v2071_v40, 8 }
 0x6b8   :  { %v2076_v27 = vadd.f32 %v2596_v13, %v2075_v31 }
 0x6ba   :  { %2114 = vxpose.xlu0.b32.cont [11/16] (narrow) %v2076_v27, 8 }
 0x6bc   :  { %v2597_v53 = vpop.f32.mrb[34].mxu1 }
 0x6bd   :  { %v2598_v41 = vpop.f32.mrb[35].mxu1 }
 0x6be   :  { %v2599_v50 = vadd.f32 %v2598_v41, %v2597_v53 }
 0x6c0   :  { %v2600_v54 = vpop.f32.mrb[36].mxu1  ;;  %v2081_v59 = vadd.f32 %v2815_v60, %v2599_v50 }
 0x6c1   :  { %v2601_v52 = vpop.f32.mrb[37].mxu1 }
 0x6c2   :  { %v2602_v7 = vadd.f32 %v2601_v52, %v2600_v54  ;;  %2115 = vxpose.xlu0.b32.cont [12/16] (narrow) %v2081_v59, 8 }
 0x6c4   :  { %v2603_v4 = vpop.f32.mrb[38].mxu1  ;;  %v2086_v14 = vadd.f32 %v2602_v7, %v2085_v3 }
 0x6c5   :  { %v2604_v58 = vpop.f32.mrb[39].mxu1 }
 0x6c6   :  { %v2605_v34 = vadd.f32 %v2604_v58, %v2603_v4  ;;  %2116 = vxpose.xlu0.b32.cont [13/16] (narrow) %v2086_v14, 8 }
 0x6c8   :  { %v2606_v12 = vpop.f32.mrb[40].mxu1  ;;  %v2091_v38 = vadd.f32 %v2818_v17, %v2605_v34 }
 0x6c9   :  { %v2607_v61 = vpop.f32.mrb[41].mxu1 }
 0x6ca   :  { %v2608_v44 = vadd.f32 %v2607_v61, %v2606_v12  ;;  %2117 = vxpose.xlu0.b32.cont [14/16] (narrow) %v2091_v38, 8 }
 0x6cc   :  { %v2609_v43 = vpop.f32.mrb[42].mxu1  ;;  %v2096_v0 = vadd.f32 %v2608_v44, %v2095_v57 }
 0x6cd   :  { %v2610_v37 = vpop.f32.mrb[43].mxu1 }
 0x6ce   :  { %v2611_v2 = vadd.f32 %v2610_v37, %v2609_v43  ;;  %2118 = vxpose.xlu0.b32.cont [15/16] (narrow) %v2096_v0, 8 }
 0x6d0   :  { %v2101_v46 = vadd.f32 %v2821_v5, %v2611_v2 }
 0x6d2   :  { %2119 = vxpose.xlu0.b32.end [16/16] (narrow) %v2101_v46, 8 }
 0x6fb   :  { %3208 = vset.pattern.permute.xlu0 %v3433_v23  ;;  %v5058_v23 = vld [vmem:[#allocation29_spill] sm:$0xff] }
 0x6fc   :  { %v2166_v60 = vrot.slane %v2161_v51, %v5058_v23 }
 0x716   :  { %v2120_v48 = vpop.trf.xlu0 }
 0x717   :  { %2137 = vrot.lane.b32.xlu1 %v2120_v48, %s3434_s1  ;;  %v2145_v32 = vrot.slane %v2120_v48, 2 }
 0x71b   :  { %2147 = vrot.lane.b32.xlu1 %v2145_v32, %s3435_s2 }
 0x789   :  { %v2138_v47 = vpop.permute.xlu1 %2137 }
 0x78a   :  { %v2139_v6 = vmul.f32 %v2138_v47, %v2136_v29 }
 0x78c   :  { %v2141_v26 = vrot.slane %v2139_v6, 7 }
 0x78d   :  { %v2148_v62 = vpop.permute.xlu1 %2147 }
 0x78e   :  { %v2152_v15 = vmul.f32 %v2150_v22, %v2148_v62  ;;  %v2143_v36 = vadd.f32 %v2141_v26, %v2120_v48 }
 0x790   :  { %v2154_v11 = vrot.slane %v2152_v15, 7 }
 0x792   :  { %v2156_v31 = vadd.f32 %v2154_v11, %v2143_v36 }
 0x794   :  { %v2167_v33 = vadd.f32 %v2166_v60, %v2156_v31 }
 0x796   :  { %2168 = vst [vmem:[%s4903_s8 - $0x1] sm:$0x2] %v2167_v33 }
 0x797   :  { %2173 = vsyncpa [#allocation4], 1 }

</bundles_post_ra>
